<compile_context>
chip_gen: v5e
topology: v5e:2x2
jax: 0.10.0
libtpu: 0.0.40
codegen_flags: <defaults>
</compile_context>

<pallas_src>
import math

import jax
import jax.numpy as jnp
from jax.experimental import pallas as pl
from jax.experimental.pallas import tpu as pltpu


# ---------------------------------------------------------------------------
# Pallas kernel
# ---------------------------------------------------------------------------
def _make_kernel(*, num_subset, inter, T, V, c_in, c_out):
    S = num_subset
    IT = inter * T               # contraction length of one attention map
    CT = c_in * T
    P1 = (2 * S + 4) * inter     # packed rows of the fused 1x1 group
    BT = P1 * T                  # lane offset where the fused (9,1) group starts
    inv_scale = 1.0 / float(IT)

    def kernel(x_ref, wp_ref, bp_ref, wd_ref, bd_ref, pa_ref, o_ref, xcat_ref):
        # x_ref   : (V, C*T)           joints on sublanes, (channel, time) lane-dense
        # wp_ref  : (C*T, P*T)         fused feature projection (1x1 + banded (9,1))
        # bp_ref  : (1, P*T)           fused feature projection bias
        # wd_ref  : ((S+1)*C*T, Co*T)  fused conv_d (BN folded) + residual/down weight
        # bd_ref  : (1, Co*T)          fused output bias (conv_d biases + BN + down)
        # pa_ref  : (S, V, V)          PA parameter, pre-transposed per subset
        # o_ref   : (V, Co*T)
        # xcat_ref: (V, (S+1)*C*T)     VMEM scratch for the fused output contraction
        x = x_ref[...]

        # stage the residual block of the fused output matmul early; the store can
        # hide under the projection matmul below.
        xcat_ref[:, S * CT:] = x

        # every 1x1 / (9,1) convolution of the module in a single MXU matmul
        f = jnp.dot(x, wp_ref[...], preferred_element_type=jnp.float32) + bp_ref[...]

        def att_t(lo_a, lo_b):
            # transposed attention map: softmax(A1 @ A2 / (inter*T), dim=-2).T
            fa = f[:, lo_a:lo_a + IT]                      # (V, inter*T)
            fb = f[:, lo_b:lo_b + IT]
            m = jax.lax.dot_general(                       # (V, V) == M^T (rows=v2)
                fb, fa, (((1,), (1,)), ((), ())),
                preferred_element_type=jnp.float32) * inv_scale
            m = m - jnp.max(m, axis=1, keepdims=True)      # lane-axis softmax
            e = jnp.exp(m)
            den = jnp.sum(e, axis=1, keepdims=True)
            # approx=True would move this onto the EUP, but exact keeps us
            # bit-close to the f32 reference and the (V, V) divide is negligible.
            return e * pl.reciprocal(den, approx=False)

        for i in range(S):
            a_lo, b_lo = i * IT, (S + i) * IT
            t1_lo, t2_lo = BT + i * IT, BT + (S + i) * IT
            if i == 1:
                # conv_ST11[1] / conv_ST12[1] are the (9,1) temporal convolutions
                s1_lo, s2_lo = BT + 2 * S * IT, BT + (2 * S + 1) * IT
            else:
                # conv_ST11[0], conv_ST11[2] (and ST12) are 1x1 convolutions
                j = 0 if i == 0 else 1
                s1_lo, s2_lo = (2 * S + j) * IT, (2 * S + 2 + j) * IT

            a_t = (pa_ref[i] + att_t(a_lo, b_lo) + att_t(t1_lo, t2_lo)
                   + att_t(s1_lo, s2_lo))                               # Atot^T (V, V)
            xcat_ref[:, i * CT:(i + 1) * CT] = jnp.dot(
                a_t, x, preferred_element_type=jnp.float32)             # (V, C*T)

        # one fused ((S+1)*C*T)-deep contraction: conv_d * BN + residual/down + bias
        y = jnp.dot(xcat_ref[...], wd_ref[...],
                    preferred_element_type=jnp.float32) + bd_ref[...]
        o_ref[...] = jnp.maximum(y, 0.0).astype(o_ref.dtype)            # ReLU

    return kernel


# ---------------------------------------------------------------------------
# Weight packing (trace-time, outside the kernel)
# ---------------------------------------------------------------------------
def _band_weight(wt, T):
    """(P, C, K) temporal taps -> (P*T, C*T) block-Toeplitz dense weight.

    dense[p*T + t, c*T + t2] = wt[p, c, t2 - t + K//2]   (zero outside the band),
    reproducing a (K, 1) conv with padding (K//2, 0).
    """
    P, C, K = wt.shape
    t = jnp.arange(T)
    k = t[None, :] - t[:, None] + K // 2
    valid = (k >= 0) & (k < K)
    big = wt[:, :, jnp.where(valid, k, 0)] * valid[None, None].astype(wt.dtype)
    return jnp.transpose(big, (0, 2, 1, 3)).reshape(P * T, C * T)


def _pack_kernel_operands(p, *, T, V):
    S, inter = p['num_subset'], p['inter']
    c_out = p['out_channels']
    eye_t = jnp.eye(T, dtype=jnp.float32)
    eps = 1e-5

    # fused feature projection.
    # 1x1 rows  : conv_a[0..S), conv_b[0..S), conv_ST11 1x1 (subsets 0,2), conv_ST12 1x1
    # (9,1) rows: conv_T1[0..S), conv_T2[0..S), conv_ST11[1], conv_ST12[1]
    w1 = jnp.concatenate(list(p['wa']) + list(p['wb'])
                         + list(p['wS11_1x1']) + list(p['wS12_1x1']), axis=0)
    b1 = jnp.concatenate(list(p['ba']) + list(p['bb'])
                         + list(p['bS11_1x1']) + list(p['bS12_1x1']), axis=0)
    wt = jnp.concatenate(list(p['wT1']) + list(p['wT2'])
                         + [p['wS11_t'], p['wS12_t']], axis=0)
    bt = jnp.concatenate(list(p['bT1']) + list(p['bT2'])
                         + [p['bS11_t'], p['bS12_t']], axis=0)
    w_proj = jnp.concatenate([jnp.kron(w1, eye_t), _band_weight(wt, T)], axis=0)
    b_proj = jnp.concatenate([jnp.repeat(b1, T), jnp.repeat(bt, T)])

    # fused output projection: eval-mode BN folded into the three conv_d branches,
    # plus the residual / `down` branch and all biases.
    s_bn = p['bn_gamma'] / jnp.sqrt(p['bn_var'] + eps)
    b_bn = p['bn_beta'] - p['bn_mean'] * s_bn
    wd_blocks = [jnp.kron(s_bn[:, None] * p['wd'][i], eye_t) for i in range(S)]
    bias = s_bn * sum(p['bd']) + b_bn
    if p['down_w'] is None:
        w_res = jnp.eye(c_out, dtype=jnp.float32)          # identity residual
    else:
        s_dn = p['down_bn_gamma'] / jnp.sqrt(p['down_bn_var'] + eps)
        w_res = s_dn[:, None] * p['down_w']
        bias = bias + s_dn * p['down_b'] + (p['down_bn_beta'] - p['down_bn_mean'] * s_dn)
    wd_blocks.append(jnp.kron(w_res, eye_t))
    wd_all = jnp.concatenate(wd_blocks, axis=1)            # (Co*T, (S+1)*C*T)

    return dict(
        w_proj_t=jnp.transpose(w_proj),                    # (C*T, P*T)
        b_proj_t=b_proj[None, :],                          # (1, P*T)
        wd_t=jnp.transpose(wd_all),                        # ((S+1)*C*T, Co*T)
        bd_t=jnp.repeat(bias, T)[None, :],                 # (1, Co*T)
        pa_t=jnp.transpose(p['PA'], (0, 2, 1)),            # (S, V, V)
    )


# ---------------------------------------------------------------------------
# Wrapper
# ---------------------------------------------------------------------------
def unit_gtcn_34_forward(x_nchw, params):
    """x_nchw: (B, C_in, T, V) float32. Returns (B, C_out, T, V)."""
    B, c_in, T, V = x_nchw.shape
    c_out = params['out_channels']
    S, inter = params['num_subset'], params['inter']
    CT, CoT = c_in * T, c_out * T

    ops = _pack_kernel_operands(params, T=T, V=V)
    PT = ops['w_proj_t'].shape[1]

    # glue: NCHW -> (B, V, C*T); joints on sublanes, (channel, time) lane-dense.
    x_vc = jnp.transpose(x_nchw, (0, 3, 1, 2)).reshape(B, V, CT)

    kernel = _make_kernel(num_subset=S, inter=inter, T=T, V=V,
                          c_in=c_in, c_out=c_out)
    out = pl.pallas_call(
        kernel,
        out_shape=jax.ShapeDtypeStruct((B, V, CoT), x_nchw.dtype),
        grid_spec=pltpu.PrefetchScalarGridSpec(
            num_scalar_prefetch=0,
            grid=(B,),
            in_specs=[
                pl.BlockSpec((pl.Squeezed(), V, CT), lambda b: (b, 0, 0)),
                pl.BlockSpec((CT, PT), lambda b: (0, 0)),
                pl.BlockSpec((1, PT), lambda b: (0, 0)),
                pl.BlockSpec(((S + 1) * CT, CoT), lambda b: (0, 0)),
                pl.BlockSpec((1, CoT), lambda b: (0, 0)),
                pl.BlockSpec((S, V, V), lambda b: (0, 0, 0)),
            ],
            out_specs=pl.BlockSpec((pl.Squeezed(), V, CoT), lambda b: (b, 0, 0)),
            scratch_shapes=[pltpu.VMEM((V, (S + 1) * CT), jnp.float32)],
        ),
        compiler_params=pltpu.CompilerParams(
            dimension_semantics=("parallel",)),
    )(x_vc, ops['w_proj_t'], ops['b_proj_t'], ops['wd_t'], ops['bd_t'], ops['pa_t'])

    # glue: (B, V, Co*T) -> NCHW
    return out.reshape(B, V, c_out, T).transpose(0, 2, 3, 1)


# ---------------------------------------------------------------------------
# Pure-JAX reference (same math, no Pallas), eval-mode BatchNorm
# ---------------------------------------------------------------------------
def unit_gtcn_34_reference(x, p):
    B, C, T, V = x.shape
    S, inter = p['num_subset'], p['inter']
    c_out = p['out_channels']
    hp = 'highest'

    def conv1x1(inp, w, b):
        return jnp.einsum('oc,bctv->botv', w, inp, precision=hp) + b[None, :, None, None]

    def conv_t9(inp, w, b):
        K = w.shape[-1]
        xp = jnp.pad(inp, ((0, 0), (0, 0), (K // 2, K // 2), (0, 0)))
        out = sum(jnp.einsum('oc,bctv->botv', w[:, :, k], xp[:, :, k:k + T, :],
                             precision=hp) for k in range(K))
        return out + b[None, :, None, None]

    def att(fa, fb):
        a1 = jnp.transpose(fa, (0, 3, 1, 2)).reshape(B, V, inter * T)
        a2 = fb.reshape(B, inter * T, V)
        return jax.nn.softmax(jnp.matmul(a1, a2, precision=hp) / (inter * T), axis=-2)

    y = jnp.zeros((B, c_out, T, V), jnp.float32)
    for i in range(S):
        m = att(conv1x1(x, p['wa'][i], p['ba'][i]),
                conv1x1(x, p['wb'][i], p['bb'][i]))
        m = m + att(conv_t9(x, p['wT1'][i], p['bT1'][i]),
                    conv_t9(x, p['wT2'][i], p['bT2'][i]))
        if i == 1:
            m = m + att(conv_t9(x, p['wS11_t'], p['bS11_t']),
                        conv_t9(x, p['wS12_t'], p['bS12_t']))
        else:
            j = 0 if i == 0 else 1
            m = m + att(conv1x1(x, p['wS11_1x1'][j], p['bS11_1x1'][j]),
                        conv1x1(x, p['wS12_1x1'][j], p['bS12_1x1'][j]))
        a_tot = p['PA'][i][None] + m
        xz = jnp.matmul(x.reshape(B, C * T, V), a_tot, precision=hp).reshape(B, C, T, V)
        y = y + conv1x1(xz, p['wd'][i], p['bd'][i])

    eps = 1e-5
    s = p['bn_gamma'] / jnp.sqrt(p['bn_var'] + eps)
    b = p['bn_beta'] - p['bn_mean'] * s
    y = y * s[None, :, None, None] + b[None, :, None, None]
    if p['down_w'] is None:
        y = y + x
    else:
        sd = p['down_bn_gamma'] / jnp.sqrt(p['down_bn_var'] + eps)
        bd = p['down_bn_beta'] - p['down_bn_mean'] * sd
        y = y + (conv1x1(x, p['down_w'], p['down_b']) * sd[None, :, None, None]
                 + bd[None, :, None, None])
    return jnp.maximum(y, 0.0)


# ---------------------------------------------------------------------------
# Parameter init mirroring the PyTorch module's initializers
# ---------------------------------------------------------------------------
def init_params(key, *, in_channels, out_channels, num_subset=3, coff_embedding=4, V=16):
    S = num_subset
    inter = out_channels // coff_embedding
    keys = iter(jax.random.split(key, 40))

    def kaiming(out_c, in_c, kh=1):
        # nn.init.kaiming_normal_(w, mode='fan_out'); fan_out = out_c * kh * 1
        std = math.sqrt(2.0 / (out_c * kh))
        shape = (out_c, in_c) if kh == 1 else (out_c, in_c, kh)
        return std * jax.random.normal(next(keys), shape, dtype=jnp.float32)

    def zeros(n):
        return jnp.zeros((n,), jnp.float32)

    p = dict(num_subset=S, inter=inter,
             in_channels=in_channels, out_channels=out_channels)
    p['wa'] = [kaiming(inter, in_channels) for _ in range(S)]
    p['ba'] = [zeros(inter) for _ in range(S)]
    p['wb'] = [kaiming(inter, in_channels) for _ in range(S)]
    p['bb'] = [zeros(inter) for _ in range(S)]
    # conv_d: conv_branch_init -> normal(0, sqrt(2 / (out*in*1*num_subset))), bias 0
    d_std = math.sqrt(2.0 / (out_channels * in_channels * 1 * S))
    p['wd'] = [d_std * jax.random.normal(next(keys), (out_channels, in_channels),
                                         dtype=jnp.float32) for _ in range(S)]
    p['bd'] = [zeros(out_channels) for _ in range(S)]
    p['wT1'] = [kaiming(inter, in_channels, kh=9) for _ in range(S)]
    p['bT1'] = [zeros(inter) for _ in range(S)]
    p['wT2'] = [kaiming(inter, in_channels, kh=9) for _ in range(S)]
    p['bT2'] = [zeros(inter) for _ in range(S)]
    # conv_ST11 / conv_ST12 alternate 1x1 and (9,1) modules; forward() only uses
    # indices 0..2 -> 1x1 (subset 0), (9,1) (subset 1), 1x1 (subset 2).
    p['wS11_1x1'] = [kaiming(inter, in_channels) for _ in range(2)]
    p['bS11_1x1'] = [zeros(inter) for _ in range(2)]
    p['wS11_t'] = kaiming(inter, in_channels, kh=9)
    p['bS11_t'] = zeros(inter)
    p['wS12_1x1'] = [kaiming(inter, in_channels) for _ in range(2)]
    p['bS12_1x1'] = [zeros(inter) for _ in range(2)]
    p['wS12_t'] = kaiming(inter, in_channels, kh=9)
    p['bS12_t'] = zeros(inter)
    # PA: nn.init.constant(self.PA, 1e-6)
    p['PA'] = jnp.full((S, V, V), 1e-6, jnp.float32)
    # self.bn: bn_init(self.bn, 1e-6); eval-mode running stats (mean 0, var 1)
    p['bn_gamma'] = jnp.full((out_channels,), 1e-6, jnp.float32)
    p['bn_beta'] = zeros(out_channels)
    p['bn_mean'] = zeros(out_channels)
    p['bn_var'] = jnp.ones((out_channels,), jnp.float32)
    if in_channels != out_channels:
        p['down_w'] = kaiming(out_channels, in_channels)
        p['down_b'] = zeros(out_channels)
        p['down_bn_gamma'] = jnp.ones((out_channels,), jnp.float32)
        p['down_bn_beta'] = zeros(out_channels)
        p['down_bn_mean'] = zeros(out_channels)
        p['down_bn_var'] = jnp.ones((out_channels,), jnp.float32)
    else:
        p['down_w'] = None
    return p


if __name__ == "__main__":
    B, C_in, C_out, T, V = 2, 8, 8, 16, 16

    key = jax.random.PRNGKey(0)
    k_x, k_p = jax.random.split(key)
    x = jax.random.normal(k_x, (B, C_in, T, V), dtype=jnp.float32)
    params = init_params(k_p, in_channels=C_in, out_channels=C_out, V=V)

    out = jax.block_until_ready(unit_gtcn_34_forward(x, params))
    ref = unit_gtcn_34_reference(x, params)
    assert out.shape == (B, C_out, T, V)
    assert jnp.allclose(out, ref, atol=1e-4, rtol=1e-4), \
        float(jnp.max(jnp.abs(out - ref)))

    # Second check with non-degenerate BN / PA so the whole attention path is
    # exercised (the module's own init sets bn.weight = PA = 1e-6, which makes the
    # GCN branch almost invisible next to the residual).
    k1, k2, k3 = jax.random.split(jax.random.PRNGKey(1), 3)
    params2 = dict(params)
    params2['bn_gamma'] = 1.0 + 0.1 * jax.random.normal(k1, (C_out,), jnp.float32)
    params2['bn_beta'] = 0.1 * jax.random.normal(k2, (C_out,), jnp.float32)
    params2['PA'] = 0.05 * jax.random.normal(k3, (3, V, V), jnp.float32)
    out2 = jax.block_until_ready(unit_gtcn_34_forward(x, params2))
    ref2 = unit_gtcn_34_reference(x, params2)
    assert jnp.allclose(out2, ref2, atol=5e-3, rtol=5e-3), \
        float(jnp.max(jnp.abs(out2 - ref2)))

    # Third check: in_channels != out_channels exercises the `down` (1x1 conv + BN)
    # residual branch that is folded into the packed output weight.
    C_in3 = 16
    kx3, kp3, kg3, kb3, kpa3 = jax.random.split(jax.random.PRNGKey(2), 5)
    x3 = jax.random.normal(kx3, (B, C_in3, T, V), dtype=jnp.float32)
    params3 = init_params(kp3, in_channels=C_in3, out_channels=C_out, V=V)
    params3['bn_gamma'] = 1.0 + 0.1 * jax.random.normal(kg3, (C_out,), jnp.float32)
    params3['bn_beta'] = 0.1 * jax.random.normal(kb3, (C_out,), jnp.float32)
    params3['PA'] = 0.05 * jax.random.normal(kpa3, (3, V, V), jnp.float32)
    out3 = jax.block_until_ready(unit_gtcn_34_forward(x3, params3))
    ref3 = unit_gtcn_34_reference(x3, params3)
    assert out3.shape == (B, C_out, T, V)
    assert jnp.allclose(out3, ref3, atol=5e-3, rtol=5e-3), \
        float(jnp.max(jnp.abs(out3 - ref3)))

    print("KERNEL_OK")
</pallas_src>

<mosaic_0001>
module attributes {stable_mosaic.version = 11 : i64} {
  func.func @kernel(%arg0: i32, %arg1: memref<1x16x128xf32, #tpu.memory_space<vmem>>, %arg2: memref<128x576xf32, #tpu.memory_space<vmem>>, %arg3: memref<1x576xf32, #tpu.memory_space<vmem>>, %arg4: memref<512x128xf32, #tpu.memory_space<vmem>>, %arg5: memref<1x128xf32, #tpu.memory_space<vmem>>, %arg6: memref<3x16x16xf32, #tpu.memory_space<vmem>>, %arg7: memref<1x16x128xf32, #tpu.memory_space<vmem>>, %arg8: memref<16x512xf32, #tpu.memory_space<vmem>>) attributes {dimension_semantics = [#tpu.dimension_semantics<parallel>], iteration_bounds = array<i64: 2>, scalar_prefetch = 0 : i64, scratch_operands = 1 : i64, tpu.core_type = #tpu.core_type<tc>, window_params = [{transform_indices = @transform_0, window_bounds = array<i64: 1, 16, 128>}, {pipeline_mode = #tpu.pipeline_mode<synchronous>, transform_indices = @transform_1, window_bounds = array<i64: 128, 576>}, {pipeline_mode = #tpu.pipeline_mode<synchronous>, transform_indices = @transform_2, window_bounds = array<i64: 1, 576>}, {pipeline_mode = #tpu.pipeline_mode<synchronous>, transform_indices = @transform_3, window_bounds = array<i64: 512, 128>}, {pipeline_mode = #tpu.pipeline_mode<synchronous>, transform_indices = @transform_4, window_bounds = array<i64: 1, 128>}, {pipeline_mode = #tpu.pipeline_mode<synchronous>, transform_indices = @transform_5, window_bounds = array<i64: 3, 16, 16>}, {transform_indices = @transform_6, window_bounds = array<i64: 1, 16, 128>}]} {
    %c0 = arith.constant 0 : index
    %c0_0 = arith.constant 0 : index
    %c0_1 = arith.constant 0 : index
    %0 = vector.load %arg1[%c0, %c0_0, %c0_1] : memref<1x16x128xf32, #tpu.memory_space<vmem>>, vector<1x16x128xf32>
    %1 = vector.shape_cast %0 : vector<1x16x128xf32> to vector<16x128xf32>
    %c0_2 = arith.constant 0 : index
    %c384 = arith.constant 384 : index
    %2 = vector.load %arg8[%c0_2, %c384] : memref<16x512xf32, #tpu.memory_space<vmem>>, vector<16x128xf32>
    tpu.vector_store %arg8[%c0_2, %c384], %1 {strides = array<i32>} : memref<16x512xf32, #tpu.memory_space<vmem>>, vector<16x128xf32>,
    %c0_3 = arith.constant 0 : index
    %c0_4 = arith.constant 0 : index
    %3 = vector.load %arg2[%c0_3, %c0_4] : memref<128x576xf32, #tpu.memory_space<vmem>>, vector<128x576xf32>
    %cst = arith.constant dense<0.000000e+00> : vector<16x576xf32>
    %4 = tpu.matmul %1, %3, %cst {dimension_numbers = #tpu.dot_dimension_numbers<[1], [0], [0], [1], [0, 0, 1, 1], [], []>} : vector<16x128xf32>, vector<128x576xf32>, vector<16x576xf32> -> vector<16x576xf32>
    %c0_5 = arith.constant 0 : index
    %c0_6 = arith.constant 0 : index
    %5 = vector.load %arg3[%c0_5, %c0_6] : memref<1x576xf32, #tpu.memory_space<vmem>>, vector<1x576xf32>
    %6 = vector.broadcast %5 : vector<1x576xf32> to vector<16x576xf32>
    %7 = arith.addf %4, %6 : vector<16x576xf32>
    %c0_7 = arith.constant 0 : index
    %c0_8 = arith.constant 0 : index
    %c0_9 = arith.constant 0 : index
    %8 = vector.load %arg6[%c0_7, %c0_8, %c0_9] : memref<3x16x16xf32, #tpu.memory_space<vmem>>, vector<1x16x16xf32>
    %9 = vector.shape_cast %8 : vector<1x16x16xf32> to vector<16x16xf32>
    %10 = vector.extract_strided_slice %7 {offsets = [0, 0], sizes = [16, 32], strides = [1, 1]} : vector<16x576xf32> to vector<16x32xf32>
    %11 = vector.extract_strided_slice %7 {offsets = [0, 96], sizes = [16, 32], strides = [1, 1]} : vector<16x576xf32> to vector<16x32xf32>
    %cst_10 = arith.constant dense<0.000000e+00> : vector<16x16xf32>
    %12 = tpu.matmul %11, %10, %cst_10 {dimension_numbers = #tpu.dot_dimension_numbers<[1], [1], [0], [0], [0, 0, 1, 0], [], []>} : vector<16x32xf32>, vector<16x32xf32>, vector<16x16xf32> -> vector<16x16xf32>
    %cst_11 = arith.constant 3.125000e-02 : f32
    %13 = vector.broadcast %cst_11 : f32 to vector<16x16xf32>
    %14 = arith.mulf %12, %13 : vector<16x16xf32>
    %cst_12 = arith.constant dense<0xFF800000> : vector<16xf32>
    %15 = vector.multi_reduction <maximumf>, %14, %cst_12 [1] : vector<16x16xf32> to vector<16xf32>
    %16 = vector.shape_cast %15 : vector<16xf32> to vector<16x1xf32>
    %17 = vector.broadcast %16 : vector<16x1xf32> to vector<16x16xf32>
    %18 = arith.subf %14, %17 : vector<16x16xf32>
    %19 = math.exp %18 : vector<16x16xf32>
    %cst_13 = arith.constant dense<0.000000e+00> : vector<16xf32>
    %20 = vector.multi_reduction <add>, %19, %cst_13 [1] : vector<16x16xf32> to vector<16xf32>
    %21 = vector.shape_cast %20 : vector<16xf32> to vector<16x1xf32>
    %22 = tpu.reciprocal %21 : vector<16x1xf32> -> vector<16x1xf32>
    %23 = vector.broadcast %22 : vector<16x1xf32> to vector<16x16xf32>
    %24 = arith.mulf %19, %23 : vector<16x16xf32>
    %25 = arith.addf %9, %24 : vector<16x16xf32>
    %26 = vector.extract_strided_slice %7 {offsets = [0, 320], sizes = [16, 32], strides = [1, 1]} : vector<16x576xf32> to vector<16x32xf32>
    %27 = vector.extract_strided_slice %7 {offsets = [0, 416], sizes = [16, 32], strides = [1, 1]} : vector<16x576xf32> to vector<16x32xf32>
    %cst_14 = arith.constant dense<0.000000e+00> : vector<16x16xf32>
    %28 = tpu.matmul %27, %26, %cst_14 {dimension_numbers = #tpu.dot_dimension_numbers<[1], [1], [0], [0], [0, 0, 1, 0], [], []>} : vector<16x32xf32>, vector<16x32xf32>, vector<16x16xf32> -> vector<16x16xf32>
    %cst_15 = arith.constant 3.125000e-02 : f32
    %29 = vector.broadcast %cst_15 : f32 to vector<16x16xf32>
    %30 = arith.mulf %28, %29 : vector<16x16xf32>
    %cst_16 = arith.constant dense<0xFF800000> : vector<16xf32>
    %31 = vector.multi_reduction <maximumf>, %30, %cst_16 [1] : vector<16x16xf32> to vector<16xf32>
    %32 = vector.shape_cast %31 : vector<16xf32> to vector<16x1xf32>
    %33 = vector.broadcast %32 : vector<16x1xf32> to vector<16x16xf32>
    %34 = arith.subf %30, %33 : vector<16x16xf32>
    %35 = math.exp %34 : vector<16x16xf32>
    %cst_17 = arith.constant dense<0.000000e+00> : vector<16xf32>
    %36 = vector.multi_reduction <add>, %35, %cst_17 [1] : vector<16x16xf32> to vector<16xf32>
    %37 = vector.shape_cast %36 : vector<16xf32> to vector<16x1xf32>
    %38 = tpu.reciprocal %37 : vector<16x1xf32> -> vector<16x1xf32>
    %39 = vector.broadcast %38 : vector<16x1xf32> to vector<16x16xf32>
    %40 = arith.mulf %35, %39 : vector<16x16xf32>
    %41 = arith.addf %25, %40 : vector<16x16xf32>
    %42 = vector.extract_strided_slice %7 {offsets = [0, 192], sizes = [16, 32], strides = [1, 1]} : vector<16x576xf32> to vector<16x32xf32>
    %43 = vector.extract_strided_slice %7 {offsets = [0, 256], sizes = [16, 32], strides = [1, 1]} : vector<16x576xf32> to vector<16x32xf32>
    %cst_18 = arith.constant dense<0.000000e+00> : vector<16x16xf32>
    %44 = tpu.matmul %43, %42, %cst_18 {dimension_numbers = #tpu.dot_dimension_numbers<[1], [1], [0], [0], [0, 0, 1, 0], [], []>} : vector<16x32xf32>, vector<16x32xf32>, vector<16x16xf32> -> vector<16x16xf32>
    %cst_19 = arith.constant 3.125000e-02 : f32
    %45 = vector.broadcast %cst_19 : f32 to vector<16x16xf32>
    %46 = arith.mulf %44, %45 : vector<16x16xf32>
    %cst_20 = arith.constant dense<0xFF800000> : vector<16xf32>
    %47 = vector.multi_reduction <maximumf>, %46, %cst_20 [1] : vector<16x16xf32> to vector<16xf32>
    %48 = vector.shape_cast %47 : vector<16xf32> to vector<16x1xf32>
    %49 = vector.broadcast %48 : vector<16x1xf32> to vector<16x16xf32>
    %50 = arith.subf %46, %49 : vector<16x16xf32>
    %51 = math.exp %50 : vector<16x16xf32>
    %cst_21 = arith.constant dense<0.000000e+00> : vector<16xf32>
    %52 = vector.multi_reduction <add>, %51, %cst_21 [1] : vector<16x16xf32> to vector<16xf32>
    %53 = vector.shape_cast %52 : vector<16xf32> to vector<16x1xf32>
    %54 = tpu.reciprocal %53 : vector<16x1xf32> -> vector<16x1xf32>
    %55 = vector.broadcast %54 : vector<16x1xf32> to vector<16x16xf32>
    %56 = arith.mulf %51, %55 : vector<16x16xf32>
    %57 = arith.addf %41, %56 : vector<16x16xf32>
    %cst_22 = arith.constant dense<0.000000e+00> : vector<16x128xf32>
    %58 = tpu.matmul %57, %1, %cst_22 {dimension_numbers = #tpu.dot_dimension_numbers<[1], [0], [0], [1], [0, 0, 1, 1], [], []>} : vector<16x16xf32>, vector<16x128xf32>, vector<16x128xf32> -> vector<16x128xf32>
    %c0_23 = arith.constant 0 : index
    %c0_24 = arith.constant 0 : index
    %59 = vector.load %arg8[%c0_23, %c0_24] : memref<16x512xf32, #tpu.memory_space<vmem>>, vector<16x128xf32>
    tpu.vector_store %arg8[%c0_23, %c0_24], %58 {strides = array<i32>} : memref<16x512xf32, #tpu.memory_space<vmem>>, vector<16x128xf32>,
    %c1 = arith.constant 1 : index
    %c0_25 = arith.constant 0 : index
    %c0_26 = arith.constant 0 : index
    %60 = vector.load %arg6[%c1, %c0_25, %c0_26] : memref<3x16x16xf32, #tpu.memory_space<vmem>>, vector<1x16x16xf32>
    %61 = vector.shape_cast %60 : vector<1x16x16xf32> to vector<16x16xf32>
    %62 = vector.extract_strided_slice %7 {offsets = [0, 32], sizes = [16, 32], strides = [1, 1]} : vector<16x576xf32> to vector<16x32xf32>
    %63 = vector.extract_strided_slice %7 {offsets = [0, 128], sizes = [16, 32], strides = [1, 1]} : vector<16x576xf32> to vector<16x32xf32>
    %cst_27 = arith.constant dense<0.000000e+00> : vector<16x16xf32>
    %64 = tpu.matmul %63, %62, %cst_27 {dimension_numbers = #tpu.dot_dimension_numbers<[1], [1], [0], [0], [0, 0, 1, 0], [], []>} : vector<16x32xf32>, vector<16x32xf32>, vector<16x16xf32> -> vector<16x16xf32>
    %cst_28 = arith.constant 3.125000e-02 : f32
    %65 = vector.broadcast %cst_28 : f32 to vector<16x16xf32>
    %66 = arith.mulf %64, %65 : vector<16x16xf32>
    %cst_29 = arith.constant dense<0xFF800000> : vector<16xf32>
    %67 = vector.multi_reduction <maximumf>, %66, %cst_29 [1] : vector<16x16xf32> to vector<16xf32>
    %68 = vector.shape_cast %67 : vector<16xf32> to vector<16x1xf32>
    %69 = vector.broadcast %68 : vector<16x1xf32> to vector<16x16xf32>
    %70 = arith.subf %66, %69 : vector<16x16xf32>
    %71 = math.exp %70 : vector<16x16xf32>
    %cst_30 = arith.constant dense<0.000000e+00> : vector<16xf32>
    %72 = vector.multi_reduction <add>, %71, %cst_30 [1] : vector<16x16xf32> to vector<16xf32>
    %73 = vector.shape_cast %72 : vector<16xf32> to vector<16x1xf32>
    %74 = tpu.reciprocal %73 : vector<16x1xf32> -> vector<16x1xf32>
    %75 = vector.broadcast %74 : vector<16x1xf32> to vector<16x16xf32>
    %76 = arith.mulf %71, %75 : vector<16x16xf32>
    %77 = arith.addf %61, %76 : vector<16x16xf32>
    %78 = vector.extract_strided_slice %7 {offsets = [0, 352], sizes = [16, 32], strides = [1, 1]} : vector<16x576xf32> to vector<16x32xf32>
    %79 = vector.extract_strided_slice %7 {offsets = [0, 448], sizes = [16, 32], strides = [1, 1]} : vector<16x576xf32> to vector<16x32xf32>
    %cst_31 = arith.constant dense<0.000000e+00> : vector<16x16xf32>
    %80 = tpu.matmul %79, %78, %cst_31 {dimension_numbers = #tpu.dot_dimension_numbers<[1], [1], [0], [0], [0, 0, 1, 0], [], []>} : vector<16x32xf32>, vector<16x32xf32>, vector<16x16xf32> -> vector<16x16xf32>
    %cst_32 = arith.constant 3.125000e-02 : f32
    %81 = vector.broadcast %cst_32 : f32 to vector<16x16xf32>
    %82 = arith.mulf %80, %81 : vector<16x16xf32>
    %cst_33 = arith.constant dense<0xFF800000> : vector<16xf32>
    %83 = vector.multi_reduction <maximumf>, %82, %cst_33 [1] : vector<16x16xf32> to vector<16xf32>
    %84 = vector.shape_cast %83 : vector<16xf32> to vector<16x1xf32>
    %85 = vector.broadcast %84 : vector<16x1xf32> to vector<16x16xf32>
    %86 = arith.subf %82, %85 : vector<16x16xf32>
    %87 = math.exp %86 : vector<16x16xf32>
    %cst_34 = arith.constant dense<0.000000e+00> : vector<16xf32>
    %88 = vector.multi_reduction <add>, %87, %cst_34 [1] : vector<16x16xf32> to vector<16xf32>
    %89 = vector.shape_cast %88 : vector<16xf32> to vector<16x1xf32>
    %90 = tpu.reciprocal %89 : vector<16x1xf32> -> vector<16x1xf32>
    %91 = vector.broadcast %90 : vector<16x1xf32> to vector<16x16xf32>
    %92 = arith.mulf %87, %91 : vector<16x16xf32>
    %93 = arith.addf %77, %92 : vector<16x16xf32>
    %94 = vector.extract_strided_slice %7 {offsets = [0, 512], sizes = [16, 32], strides = [1, 1]} : vector<16x576xf32> to vector<16x32xf32>
    %95 = vector.extract_strided_slice %7 {offsets = [0, 544], sizes = [16, 32], strides = [1, 1]} : vector<16x576xf32> to vector<16x32xf32>
    %cst_35 = arith.constant dense<0.000000e+00> : vector<16x16xf32>
    %96 = tpu.matmul %95, %94, %cst_35 {dimension_numbers = #tpu.dot_dimension_numbers<[1], [1], [0], [0], [0, 0, 1, 0], [], []>} : vector<16x32xf32>, vector<16x32xf32>, vector<16x16xf32> -> vector<16x16xf32>
    %cst_36 = arith.constant 3.125000e-02 : f32
    %97 = vector.broadcast %cst_36 : f32 to vector<16x16xf32>
    %98 = arith.mulf %96, %97 : vector<16x16xf32>
    %cst_37 = arith.constant dense<0xFF800000> : vector<16xf32>
    %99 = vector.multi_reduction <maximumf>, %98, %cst_37 [1] : vector<16x16xf32> to vector<16xf32>
    %100 = vector.shape_cast %99 : vector<16xf32> to vector<16x1xf32>
    %101 = vector.broadcast %100 : vector<16x1xf32> to vector<16x16xf32>
    %102 = arith.subf %98, %101 : vector<16x16xf32>
    %103 = math.exp %102 : vector<16x16xf32>
    %cst_38 = arith.constant dense<0.000000e+00> : vector<16xf32>
    %104 = vector.multi_reduction <add>, %103, %cst_38 [1] : vector<16x16xf32> to vector<16xf32>
    %105 = vector.shape_cast %104 : vector<16xf32> to vector<16x1xf32>
    %106 = tpu.reciprocal %105 : vector<16x1xf32> -> vector<16x1xf32>
    %107 = vector.broadcast %106 : vector<16x1xf32> to vector<16x16xf32>
    %108 = arith.mulf %103, %107 : vector<16x16xf32>
    %109 = arith.addf %93, %108 : vector<16x16xf32>
    %cst_39 = arith.constant dense<0.000000e+00> : vector<16x128xf32>
    %110 = tpu.matmul %109, %1, %cst_39 {dimension_numbers = #tpu.dot_dimension_numbers<[1], [0], [0], [1], [0, 0, 1, 1], [], []>} : vector<16x16xf32>, vector<16x128xf32>, vector<16x128xf32> -> vector<16x128xf32>
    %c0_40 = arith.constant 0 : index
    %c128 = arith.constant 128 : index
    %111 = vector.load %arg8[%c0_40, %c128] : memref<16x512xf32, #tpu.memory_space<vmem>>, vector<16x128xf32>
    tpu.vector_store %arg8[%c0_40, %c128], %110 {strides = array<i32>} : memref<16x512xf32, #tpu.memory_space<vmem>>, vector<16x128xf32>,
    %c2 = arith.constant 2 : index
    %c0_41 = arith.constant 0 : index
    %c0_42 = arith.constant 0 : index
    %112 = vector.load %arg6[%c2, %c0_41, %c0_42] : memref<3x16x16xf32, #tpu.memory_space<vmem>>, vector<1x16x16xf32>
    %113 = vector.shape_cast %112 : vector<1x16x16xf32> to vector<16x16xf32>
    %114 = vector.extract_strided_slice %7 {offsets = [0, 64], sizes = [16, 32], strides = [1, 1]} : vector<16x576xf32> to vector<16x32xf32>
    %115 = vector.extract_strided_slice %7 {offsets = [0, 160], sizes = [16, 32], strides = [1, 1]} : vector<16x576xf32> to vector<16x32xf32>
    %cst_43 = arith.constant dense<0.000000e+00> : vector<16x16xf32>
    %116 = tpu.matmul %115, %114, %cst_43 {dimension_numbers = #tpu.dot_dimension_numbers<[1], [1], [0], [0], [0, 0, 1, 0], [], []>} : vector<16x32xf32>, vector<16x32xf32>, vector<16x16xf32> -> vector<16x16xf32>
    %cst_44 = arith.constant 3.125000e-02 : f32
    %117 = vector.broadcast %cst_44 : f32 to vector<16x16xf32>
    %118 = arith.mulf %116, %117 : vector<16x16xf32>
    %cst_45 = arith.constant dense<0xFF800000> : vector<16xf32>
    %119 = vector.multi_reduction <maximumf>, %118, %cst_45 [1] : vector<16x16xf32> to vector<16xf32>
    %120 = vector.shape_cast %119 : vector<16xf32> to vector<16x1xf32>
    %121 = vector.broadcast %120 : vector<16x1xf32> to vector<16x16xf32>
    %122 = arith.subf %118, %121 : vector<16x16xf32>
    %123 = math.exp %122 : vector<16x16xf32>
    %cst_46 = arith.constant dense<0.000000e+00> : vector<16xf32>
    %124 = vector.multi_reduction <add>, %123, %cst_46 [1] : vector<16x16xf32> to vector<16xf32>
    %125 = vector.shape_cast %124 : vector<16xf32> to vector<16x1xf32>
    %126 = tpu.reciprocal %125 : vector<16x1xf32> -> vector<16x1xf32>
    %127 = vector.broadcast %126 : vector<16x1xf32> to vector<16x16xf32>
    %128 = arith.mulf %123, %127 : vector<16x16xf32>
    %129 = arith.addf %113, %128 : vector<16x16xf32>
    %130 = vector.extract_strided_slice %7 {offsets = [0, 384], sizes = [16, 32], strides = [1, 1]} : vector<16x576xf32> to vector<16x32xf32>
    %131 = vector.extract_strided_slice %7 {offsets = [0, 480], sizes = [16, 32], strides = [1, 1]} : vector<16x576xf32> to vector<16x32xf32>
    %cst_47 = arith.constant dense<0.000000e+00> : vector<16x16xf32>
    %132 = tpu.matmul %131, %130, %cst_47 {dimension_numbers = #tpu.dot_dimension_numbers<[1], [1], [0], [0], [0, 0, 1, 0], [], []>} : vector<16x32xf32>, vector<16x32xf32>, vector<16x16xf32> -> vector<16x16xf32>
    %cst_48 = arith.constant 3.125000e-02 : f32
    %133 = vector.broadcast %cst_48 : f32 to vector<16x16xf32>
    %134 = arith.mulf %132, %133 : vector<16x16xf32>
    %cst_49 = arith.constant dense<0xFF800000> : vector<16xf32>
    %135 = vector.multi_reduction <maximumf>, %134, %cst_49 [1] : vector<16x16xf32> to vector<16xf32>
    %136 = vector.shape_cast %135 : vector<16xf32> to vector<16x1xf32>
    %137 = vector.broadcast %136 : vector<16x1xf32> to vector<16x16xf32>
    %138 = arith.subf %134, %137 : vector<16x16xf32>
    %139 = math.exp %138 : vector<16x16xf32>
    %cst_50 = arith.constant dense<0.000000e+00> : vector<16xf32>
    %140 = vector.multi_reduction <add>, %139, %cst_50 [1] : vector<16x16xf32> to vector<16xf32>
    %141 = vector.shape_cast %140 : vector<16xf32> to vector<16x1xf32>
    %142 = tpu.reciprocal %141 : vector<16x1xf32> -> vector<16x1xf32>
    %143 = vector.broadcast %142 : vector<16x1xf32> to vector<16x16xf32>
    %144 = arith.mulf %139, %143 : vector<16x16xf32>
    %145 = arith.addf %129, %144 : vector<16x16xf32>
    %146 = vector.extract_strided_slice %7 {offsets = [0, 224], sizes = [16, 32], strides = [1, 1]} : vector<16x576xf32> to vector<16x32xf32>
    %147 = vector.extract_strided_slice %7 {offsets = [0, 288], sizes = [16, 32], strides = [1, 1]} : vector<16x576xf32> to vector<16x32xf32>
    %cst_51 = arith.constant dense<0.000000e+00> : vector<16x16xf32>
    %148 = tpu.matmul %147, %146, %cst_51 {dimension_numbers = #tpu.dot_dimension_numbers<[1], [1], [0], [0], [0, 0, 1, 0], [], []>} : vector<16x32xf32>, vector<16x32xf32>, vector<16x16xf32> -> vector<16x16xf32>
    %cst_52 = arith.constant 3.125000e-02 : f32
    %149 = vector.broadcast %cst_52 : f32 to vector<16x16xf32>
    %150 = arith.mulf %148, %149 : vector<16x16xf32>
    %cst_53 = arith.constant dense<0xFF800000> : vector<16xf32>
    %151 = vector.multi_reduction <maximumf>, %150, %cst_53 [1] : vector<16x16xf32> to vector<16xf32>
    %152 = vector.shape_cast %151 : vector<16xf32> to vector<16x1xf32>
    %153 = vector.broadcast %152 : vector<16x1xf32> to vector<16x16xf32>
    %154 = arith.subf %150, %153 : vector<16x16xf32>
    %155 = math.exp %154 : vector<16x16xf32>
    %cst_54 = arith.constant dense<0.000000e+00> : vector<16xf32>
    %156 = vector.multi_reduction <add>, %155, %cst_54 [1] : vector<16x16xf32> to vector<16xf32>
    %157 = vector.shape_cast %156 : vector<16xf32> to vector<16x1xf32>
    %158 = tpu.reciprocal %157 : vector<16x1xf32> -> vector<16x1xf32>
    %159 = vector.broadcast %158 : vector<16x1xf32> to vector<16x16xf32>
    %160 = arith.mulf %155, %159 : vector<16x16xf32>
    %161 = arith.addf %145, %160 : vector<16x16xf32>
    %cst_55 = arith.constant dense<0.000000e+00> : vector<16x128xf32>
    %162 = tpu.matmul %161, %1, %cst_55 {dimension_numbers = #tpu.dot_dimension_numbers<[1], [0], [0], [1], [0, 0, 1, 1], [], []>} : vector<16x16xf32>, vector<16x128xf32>, vector<16x128xf32> -> vector<16x128xf32>
    %c0_56 = arith.constant 0 : index
    %c256 = arith.constant 256 : index
    %163 = vector.load %arg8[%c0_56, %c256] : memref<16x512xf32, #tpu.memory_space<vmem>>, vector<16x128xf32>
    tpu.vector_store %arg8[%c0_56, %c256], %162 {strides = array<i32>} : memref<16x512xf32, #tpu.memory_space<vmem>>, vector<16x128xf32>,
    %c0_57 = arith.constant 0 : index
    %c0_58 = arith.constant 0 : index
    %164 = vector.load %arg8[%c0_57, %c0_58] : memref<16x512xf32, #tpu.memory_space<vmem>>, vector<16x512xf32>
    %c0_59 = arith.constant 0 : index
    %c0_60 = arith.constant 0 : index
    %165 = vector.load %arg4[%c0_59, %c0_60] : memref<512x128xf32, #tpu.memory_space<vmem>>, vector<512x128xf32>
    %cst_61 = arith.constant dense<0.000000e+00> : vector<16x128xf32>
    %166 = tpu.matmul %164, %165, %cst_61 {dimension_numbers = #tpu.dot_dimension_numbers<[1], [0], [0], [1], [0, 0, 1, 1], [], []>} : vector<16x512xf32>, vector<512x128xf32>, vector<16x128xf32> -> vector<16x128xf32>
    %c0_62 = arith.constant 0 : index
    %c0_63 = arith.constant 0 : index
    %167 = vector.load %arg5[%c0_62, %c0_63] : memref<1x128xf32, #tpu.memory_space<vmem>>, vector<1x128xf32>
    %168 = vector.broadcast %167 : vector<1x128xf32> to vector<16x128xf32>
    %169 = arith.addf %166, %168 : vector<16x128xf32>
    %cst_64 = arith.constant 0.000000e+00 : f32
    %170 = vector.broadcast %cst_64 : f32 to vector<16x128xf32>
    %171 = arith.maximumf %169, %170 : vector<16x128xf32>
    %c0_65 = arith.constant 0 : index
    %c0_66 = arith.constant 0 : index
    %c0_67 = arith.constant 0 : index
    %172 = vector.load %arg7[%c0_65, %c0_66, %c0_67] : memref<1x16x128xf32, #tpu.memory_space<vmem>>, vector<1x16x128xf32>
    %173 = vector.shape_cast %172 : vector<1x16x128xf32> to vector<16x128xf32>
    %174 = vector.shape_cast %171 : vector<16x128xf32> to vector<1x16x128xf32>
    tpu.vector_store %arg7[%c0_65, %c0_66, %c0_67], %174 {strides = array<i32>} : memref<1x16x128xf32, #tpu.memory_space<vmem>>, vector<1x16x128xf32>,
    return
  }
  func.func @transform_0(%arg0: i32) -> (i32, i32, i32) {
    %c0_i32 = arith.constant 0 : i32
    %c0_i32_0 = arith.constant 0 : i32
    %c0_i32_1 = arith.constant 0 : i32
    return %arg0, %c0_i32, %c0_i32_0 : i32, i32, i32
  }
  func.func @transform_1(%arg0: i32) -> (i32, i32) {
    %c0_i32 = arith.constant 0 : i32
    %c0_i32_0 = arith.constant 0 : i32
    %c0_i32_1 = arith.constant 0 : i32
    return %c0_i32, %c0_i32_0 : i32, i32
  }
  func.func @transform_2(%arg0: i32) -> (i32, i32) {
    %c0_i32 = arith.constant 0 : i32
    %c0_i32_0 = arith.constant 0 : i32
    %c0_i32_1 = arith.constant 0 : i32
    return %c0_i32, %c0_i32_0 : i32, i32
  }
  func.func @transform_3(%arg0: i32) -> (i32, i32) {
    %c0_i32 = arith.constant 0 : i32
    %c0_i32_0 = arith.constant 0 : i32
    %c0_i32_1 = arith.constant 0 : i32
    return %c0_i32, %c0_i32_0 : i32, i32
  }
  func.func @transform_4(%arg0: i32) -> (i32, i32) {
    %c0_i32 = arith.constant 0 : i32
    %c0_i32_0 = arith.constant 0 : i32
    %c0_i32_1 = arith.constant 0 : i32
    return %c0_i32, %c0_i32_0 : i32, i32
  }
  func.func @transform_5(%arg0: i32) -> (i32, i32, i32) {
    %c0_i32 = arith.constant 0 : i32
    %c0_i32_0 = arith.constant 0 : i32
    %c0_i32_1 = arith.constant 0 : i32
    %c0_i32_2 = arith.constant 0 : i32
    return %c0_i32, %c0_i32_0, %c0_i32_1 : i32, i32, i32
  }
  func.func @transform_6(%arg0: i32) -> (i32, i32, i32) {
    %c0_i32 = arith.constant 0 : i32
    %c0_i32_0 = arith.constant 0 : i32
    %c0_i32_1 = arith.constant 0 : i32
    return %arg0, %c0_i32, %c0_i32_0 : i32, i32, i32
  }
}

</mosaic_0001>

<bundles_post_ra>
// kernel: tpu_custom_call.1
= control target key start
LH: loop header
LB: loop body
LE: loop exit
PB: predicated region body
PF: predicated region fallthrough
CT: control target
= control target key end

     0   :  { %11 = vsyncpa [#allocation4], 0  ;;  %s3227_s0 = inlined_call_operand.vmem [shape: f32[2,16,128], index: 0, kind: input, shape index: {}]   ;;  %s3228_s1 = inlined_call_operand.vmem [shape: f32[128,576], index: 1, kind: input, shape index: {}]   ;;  %s3229_s2 = inlined_call_operand.vmem [shape: f32[1,576], index: 2, kind: input, shape index: {}]   ;;  %s3230_s3 = inlined_call_operand.vmem [shape: f32[512,128], index: 3, kind: input, shape index: {}]   ;;  %s3231_s4 = inlined_call_operand.vmem [shape: f32[1,128], index: 4, kind: input, shape index: {}]   ;;  %s3232_s5 = inlined_call_operand.vmem [shape: f32[3,16,16], index: 5, kind: input, shape index: {}]   ;;  %s3233_s6 = inlined_call_operand.hbm [shape: f32[2,16,128], index: 6, kind: output, shape index: {}]  }
   0x1   :  { %13 = vsyncpa [#allocation4 + $0x1], 0  ;;  %s1910_s21 = smov 0   ;;  %s1912_s22 = smov 0  }
   0x2   :  { %s1914_s23 = smov 0   ;;  %s1916_s24 = smov 0  }
   0x3 LB: > { %s1931_s25 = sadd.s32 4294967295, %s1868_s24   ;;  %s1623_s26 = sadd.s32 4294967294, %s1868_s24   ;;  %s1868_s24 = sphi %s1916_s24, %s3289_s24   ;;  %s1864_s23 = sphi %s1914_s23, %s3288_s23   ;;  %s1860_s22 = sphi %s1912_s22, %s3287_s22   ;;  %s1856_s21 = sphi %s1910_s21, %s3286_s21  }
   0x4   : > { %s1935_s27 = sadd.s32 1, %s1868_s24   ;;  %s157_s28 = sadd.s32 1, %s1864_s23 }
   0x5   : > { %s154_s29 = ssub.s32 %s1868_s24, %s1935_s27  ;;  %p167_p0 = scmp.ne.s32.totalorder %s1864_s23, %s1860_s22 }
   0x6   : > { %p155_p1 = scmp.eq.s32.totalorder %s154_s29, 0  ;;  %p168_p2 = scmp.eq.s32.totalorder %s1931_s25, 1 }
   0x7   : > { %p173_p3 = scmp.ne.s32.totalorder %s1860_s22, %s1856_s21  ;;  %p174_p4 = scmp.eq.s32.totalorder %s1623_s26, 1 }
   0x8   : > { %s1946_s30 = scalar_select %p155_p1, %s1864_s23, %s157_s28  }
   0x9   : > { %p1948_p5 = por %p168_p2, %p167_p0  ;;  %p1952_p6 = por %p174_p4, %p173_p3 }
   0xa   : > { %p1626_p7 = scmp.ge.s32.totalorder %s1868_s24, 1  ;;  %p215_p8 = scmp.lt.s32.totalorder %s1868_s24, 3 }
   0xc   : > { %p216_p9 = pnand %p1626_p7, %p215_p8 }
   0xd   : > { %p245_p10 = scmp.lt.s32.totalorder (!%p216_p9), %s1931_s25, 1  ;;  %s1870_s16 = smov (!%p216_p9), 96  }
   0xe   : > { %219 = sbr.rel (%p216_p9) target bundleno = 1048 (0x418), region = 44  ;;  %s1871_s17 = smov (!%p216_p9), 64  }
   0xf   : > { %s1872_s18 = smov (!%p216_p9), 32   ;;  %s242_s19 = sand.u32 (!%p216_p9), 1, %s1860_s22  }
  0x10   : > { %s1682_s20 = sshll.u32 (!%p216_p9), %s1931_s25, 4 }
  0x11   : > { %s1557_s12 = scalar_lea.hbm (!%p216_p9), %s3233_s6, %s1682_s20 }
  0x12   : > { %s1560_s14 = sshll.u32 (!%p216_p9), %s1557_s12, 4  ;;  %s1561_s14 = int_to_ptr.hbm [resolvable:$true] %s1560_s14 }
  0x13   : > { %v330_v0 = vld [vmem:[%s3228_s1 + $0x260] sm:$0xff]  ;;  %v331_v1 = vld [vmem:[%s3228_s1 + $0x268] sm:$0xff]  ;;  %v332_v2 = vld [vmem:[%s3228_s1 + $0x270] sm:$0xff]  ;;  %s2094_s28 = scalar_select %p245_p10, %s1931_s25, 1  ;;  %vm469_vm0 = vcmask 261120   ;;  %vm503_vm1 = vcmask 130048  }
  0x14   : > { %369 = vmatpush.msra.mxu1 %v330_v0  ;;  %392 = vmatpush.msra.mxu2 %v331_v1  ;;  %v329_v3 = vld [vmem:[%s3228_s1 + $0x258] sm:$0xff]  ;;  %v326_v5 = vld [vmem:[%s3228_s1 + $0x240] sm:$0xff]  ;;  %v327_v6 = vld [vmem:[%s3228_s1 + $0x248] sm:$0xff]  ;;  %s1546_s25 = scalar_lea.sflag [#allocation4], %s242_s19  ;;  %s1820_s15 = sshra.s32 %s1561_s14, 4  ;;  %s1821_s15 = int_to_ptr.hbm [resolvable:$true] %s1820_s15 }
  0x15   : > { %v325_v4 = vld [vmem:[%s3228_s1 + $0x238] sm:$0xff]  ;;  %415 = vmatpush.msra.mxu3 %v332_v2  ;;  %346 = vmatpush.msra.mxu0 %v329_v3  ;;  %v324_v7 = vld [vmem:[%s3228_s1 + $0x230] sm:$0xff]  ;;  %v322_v10 = vld [vmem:[%s3228_s1 + $0x220] sm:$0xff]  ;;  %s1681_s10 = sshll.u32 %s2094_s28, 4  ;;  %p1827_p0 = scmp.lt.s32.totalorder %s1821_s15, %s3233_s6 }
  0x16   : > { %v320_v8 = vld [vmem:[%s3228_s1 + $0x210] sm:$0xff]  ;;  %370 = vmatpush.msra.mxu1 %v325_v4  ;;  %393 = vmatpush.msra.mxu2 %v326_v5  ;;  %v321_v9 = vld [vmem:[%s3228_s1 + $0x218] sm:$0xff]  ;;  %v319_v11 = vld [vmem:[%s3228_s1 + $0x208] sm:$0xff]  ;;  %s2142_s11 = scalar_lea.vmem %s3227_s0, %s1681_s10  ;;  %s1826_s10 = scalar_lea.hbm %s3233_s6, 32 }
  0x17   : > { %416 = vmatpush.msra.mxu3 %v327_v6  ;;  %347 = vmatpush.msra.mxu0 %v324_v7  ;;  %v315_v12 = vld [vmem:[%s3228_s1 + $0x1e8] sm:$0xff]  ;;  %v316_v13 = vld [vmem:[%s3228_s1 + $0x1f0] sm:$0xff]  ;;  %v317_v14 = vld [vmem:[%s3228_s1 + $0x1f8] sm:$0xff] }
  0x18   : > { %371 = vmatpush.msra.mxu1 %v320_v8  ;;  %394 = vmatpush.msra.mxu2 %v321_v9  ;;  %v314_v15 = vld [vmem:[%s3228_s1 + $0x1e0] sm:$0xff]  ;;  %v311_v17 = vld [vmem:[%s3228_s1 + $0x1c8] sm:$0xff]  ;;  %v312_v18 = vld [vmem:[%s3228_s1 + $0x1d0] sm:$0xff] }
  0x19   : > { %417 = vmatpush.msra.mxu3 %v322_v10  ;;  %348 = vmatpush.msra.mxu0 %v319_v11  ;;  %v310_v16 = vld [vmem:[%s3228_s1 + $0x1c0] sm:$0xff]  ;;  %v309_v19 = vld [vmem:[%s3228_s1 + $0x1b8] sm:$0xff]  ;;  %v307_v22 = vld [vmem:[%s3228_s1 + $0x1a8] sm:$0xff] }
  0x1a   : > { %372 = vmatpush.msra.mxu1 %v315_v12  ;;  %395 = vmatpush.msra.mxu2 %v316_v13  ;;  %v305_v20 = vld [vmem:[%s3228_s1 + $0x198] sm:$0xff]  ;;  %v306_v21 = vld [vmem:[%s3228_s1 + $0x1a0] sm:$0xff]  ;;  %v304_v23 = vld [vmem:[%s3228_s1 + $0x190] sm:$0xff] }
  0x1b   : > { %418 = vmatpush.msra.mxu3 %v317_v14  ;;  %349 = vmatpush.msra.mxu0 %v314_v15  ;;  %v300_v24 = vld [vmem:[%s3228_s1 + $0x170] sm:$0xff]  ;;  %v301_v25 = vld [vmem:[%s3228_s1 + $0x178] sm:$0xff]  ;;  %v302_v26 = vld [vmem:[%s3228_s1 + $0x180] sm:$0xff] }
  0x1c   : > { %373 = vmatpush.msra.mxu1 %v310_v16  ;;  %396 = vmatpush.msra.mxu2 %v311_v17  ;;  %v299_v27 = vld [vmem:[%s3228_s1 + $0x168] sm:$0xff]  ;;  %v296_v29 = vld [vmem:[%s3228_s1 + $0x150] sm:$0xff]  ;;  %v297_v30 = vld [vmem:[%s3228_s1 + $0x158] sm:$0xff] }
  0x1d   : > { %419 = vmatpush.msra.mxu3 %v312_v18  ;;  %350 = vmatpush.msra.mxu0 %v309_v19  ;;  %v295_v28 = vld [vmem:[%s3228_s1 + $0x148] sm:$0xff]  ;;  %v294_v31 = vld [vmem:[%s3228_s1 + $0x140] sm:$0xff]  ;;  %v292_v34 = vld [vmem:[%s3228_s1 + $0x130] sm:$0xff] }
  0x1e   : > { %374 = vmatpush.msra.mxu1 %v305_v20  ;;  %397 = vmatpush.msra.mxu2 %v306_v21  ;;  %v290_v32 = vld [vmem:[%s3228_s1 + $0x120] sm:$0xff]  ;;  %v291_v33 = vld [vmem:[%s3228_s1 + $0x128] sm:$0xff]  ;;  %v289_v35 = vld [vmem:[%s3228_s1 + $0x118] sm:$0xff] }
  0x1f   : > { %420 = vmatpush.msra.mxu3 %v307_v22  ;;  %351 = vmatpush.msra.mxu0 %v304_v23  ;;  %v285_v36 = vld [vmem:[%s3228_s1 + $0xf8] sm:$0xff]  ;;  %v286_v37 = vld [vmem:[%s3228_s1 + $0x100] sm:$0xff]  ;;  %v287_v38 = vld [vmem:[%s3228_s1 + $0x108] sm:$0xff] }
  0x20   : > { %375 = vmatpush.msra.mxu1 %v300_v24  ;;  %398 = vmatpush.msra.mxu2 %v301_v25  ;;  %v284_v39 = vld [vmem:[%s3228_s1 + $0xf0] sm:$0xff]  ;;  %v281_v41 = vld [vmem:[%s3228_s1 + $0xd8] sm:$0xff]  ;;  %v282_v42 = vld [vmem:[%s3228_s1 + $0xe0] sm:$0xff] }
  0x21   : > { %421 = vmatpush.msra.mxu3 %v302_v26  ;;  %352 = vmatpush.msra.mxu0 %v299_v27  ;;  %v280_v40 = vld [vmem:[%s3228_s1 + $0xd0] sm:$0xff]  ;;  %v279_v43 = vld [vmem:[%s3228_s1 + $0xc8] sm:$0xff]  ;;  %v277_v46 = vld [vmem:[%s3228_s1 + $0xb8] sm:$0xff] }
  0x22   : > { %376 = vmatpush.msra.mxu1 %v295_v28  ;;  %399 = vmatpush.msra.mxu2 %v296_v29  ;;  %v275_v44 = vld [vmem:[%s3228_s1 + $0xa8] sm:$0xff]  ;;  %v276_v45 = vld [vmem:[%s3228_s1 + $0xb0] sm:$0xff]  ;;  %v274_v47 = vld [vmem:[%s3228_s1 + $0xa0] sm:$0xff] }
  0x23   : > { %422 = vmatpush.msra.mxu3 %v297_v30  ;;  %353 = vmatpush.msra.mxu0 %v294_v31  ;;  %v270_v48 = vld [vmem:[%s3228_s1 + $0x80] sm:$0xff]  ;;  %v271_v49 = vld [vmem:[%s3228_s1 + $0x88] sm:$0xff]  ;;  %v272_v50 = vld [vmem:[%s3228_s1 + $0x90] sm:$0xff] }
  0x24   : > { %377 = vmatpush.msra.mxu1 %v290_v32  ;;  %400 = vmatpush.msra.mxu2 %v291_v33  ;;  %v269_v51 = vld [vmem:[%s3228_s1 + $0x78] sm:$0xff]  ;;  %v266_v53 = vld [vmem:[%s3228_s1 + $0x60] sm:$0xff]  ;;  %v267_v54 = vld [vmem:[%s3228_s1 + $0x68] sm:$0xff] }
  0x25   : > { %423 = vmatpush.msra.mxu3 %v292_v34  ;;  %354 = vmatpush.msra.mxu0 %v289_v35  ;;  %v265_v52 = vld [vmem:[%s3228_s1 + $0x58] sm:$0xff]  ;;  %v264_v55 = vld [vmem:[%s3228_s1 + $0x50] sm:$0xff]  ;;  %v262_v58 = vld [vmem:[%s3228_s1 + $0x40] sm:$0xff] }
  0x26   : > { %378 = vmatpush.msra.mxu1 %v285_v36  ;;  %401 = vmatpush.msra.mxu2 %v286_v37  ;;  %v260_v56 = vld [vmem:[%s3228_s1 + $0x30] sm:$0xff]  ;;  %v261_v57 = vld [vmem:[%s3228_s1 + $0x38] sm:$0xff]  ;;  %v259_v59 = vld [vmem:[%s3228_s1 + $0x28] sm:$0xff] }
  0x27   : > { %424 = vmatpush.msra.mxu3 %v287_v38  ;;  %355 = vmatpush.msra.mxu0 %v284_v39  ;;  %v255_v60 = vld [vmem:[%s3228_s1 + $0x8] sm:$0xff]  ;;  %v256_v61 = vld [vmem:[%s3228_s1 + $0x10] sm:$0xff]  ;;  %v257_v62 = vld [vmem:[%s3228_s1 + $0x18] sm:$0xff] }
  0x28   : > { %379 = vmatpush.msra.mxu1 %v280_v40  ;;  %402 = vmatpush.msra.mxu2 %v281_v41  ;;  %v2160_v63 = vld [vmem:[%s2142_s11] sm:$0xff]  ;;  %v333_v1 = vld [vmem:[%s3228_s1 + $0x278] sm:$0xff]  ;;  %v328_v2 = vld [vmem:[%s3228_s1 + $0x250] sm:$0xff] }
  0x29   : > { %425 = vmatpush.msra.mxu3 %v282_v42  ;;  %356 = vmatpush.msra.mxu0 %v279_v43  ;;  %v254_v0 = vld [vmem:[%s3228_s1] sm:$0xff]  ;;  %v2176_v3 = vld [vmem:[%s2142_s11 + $0x8] sm:$0xff]  ;;  %v313_v6 = vld [vmem:[%s3228_s1 + $0x1d8] sm:$0xff] }
  0x2a   : > { %380 = vmatpush.msra.mxu1 %v275_v44  ;;  %403 = vmatpush.msra.mxu2 %v276_v45  ;;  %v323_v4 = vld [vmem:[%s3228_s1 + $0x228] sm:$0xff]  ;;  %v318_v5 = vld [vmem:[%s3228_s1 + $0x200] sm:$0xff]  ;;  %v308_v7 = vld [vmem:[%s3228_s1 + $0x1b0] sm:$0xff] }
  0x2b   : > { %426 = vmatpush.msra.mxu3 %v277_v46  ;;  %357 = vmatpush.msra.mxu0 %v274_v47  ;;  %v303_v8 = vld [vmem:[%s3228_s1 + $0x188] sm:$0xff]  ;;  %v298_v9 = vld [vmem:[%s3228_s1 + $0x160] sm:$0xff]  ;;  %v293_v10 = vld [vmem:[%s3228_s1 + $0x138] sm:$0xff] }
  0x2c   : > { %381 = vmatpush.msra.mxu1 %v270_v48  ;;  %404 = vmatpush.msra.mxu2 %v271_v49  ;;  %v288_v11 = vld [vmem:[%s3228_s1 + $0x110] sm:$0xff]  ;;  %v283_v12 = vld [vmem:[%s3228_s1 + $0xe8] sm:$0xff]  ;;  %v278_v13 = vld [vmem:[%s3228_s1 + $0xc0] sm:$0xff] }
  0x2d   : > { %427 = vmatpush.msra.mxu3 %v272_v50  ;;  %358 = vmatpush.msra.mxu0 %v269_v51  ;;  %v273_v14 = vld [vmem:[%s3228_s1 + $0x98] sm:$0xff]  ;;  %v268_v15 = vld [vmem:[%s3228_s1 + $0x70] sm:$0xff]  ;;  %v263_v16 = vld [vmem:[%s3228_s1 + $0x48] sm:$0xff] }
  0x2e   : > { %382 = vmatpush.msra.mxu1 %v265_v52  ;;  %405 = vmatpush.msra.mxu2 %v266_v53  ;;  %v258_v17 = vld [vmem:[%s3228_s1 + $0x20] sm:$0xff] }
  0x2f   : > { %428 = vmatpush.msra.mxu3 %v267_v54  ;;  %359 = vmatpush.msra.mxu0 %v264_v55  ;;  %v334_v19 = vld [vmem:[%s3229_s2] sm:$0x1f] }
  0x30   : > { %383 = vmatpush.msra.mxu1 %v260_v56  ;;  %406 = vmatpush.msra.mxu2 %v261_v57  ;;  %v339_v21 = vperm.slane %v334_v19, 3  ;;  %v337_v22 = vperm.slane %v334_v19, 1  ;;  %v336_v25 = vperm.slane %v334_v19, 0  ;;  %v338_v31 = vperm.slane %v334_v19, 2 }
  0x31   : > { %429 = vmatpush.msra.mxu3 %v262_v58  ;;  %360 = vmatpush.msra.mxu0 %v259_v59  ;;  %v340_v39 = vperm.slane %v334_v19, 4 }
  0x32   : > { %384 = vmatpush.msra.mxu1 %v255_v60  ;;  %407 = vmatpush.msra.mxu2 %v256_v61 }
  0x33   : > { %430 = vmatpush.msra.mxu3 %v257_v62  ;;  %385 = vmatmul.f32.vlgmr.msra.gmra.mxu1 %v2160_v63 }
  0x34   : > { %408 = vmatmul.f32.vlgmr.msra.gmra.mxu2 %v2160_v63  ;;  %431 = vmatmul.f32.vlgmr.msra.gmra.mxu3 %v2160_v63 }
  0x35   : > { %361 = vmatpush.msra.mxu0 %v254_v0 }
  0x36   : > { %362 = vmatmul.f32.vlgmr.msra.gmra.mxu0 %v2160_v63 }
  0x37   : > { %438 = vmatpush.msrb.mxu0 %v333_v1 }
  0x39   : > { %439 = vmatpush.msrb.mxu0 %v328_v2 }
  0x3b   : > { %388 = vmatmul.f32.gmra.mxu1 %v2176_v3  ;;  %440 = vmatpush.msrb.mxu0 %v323_v4 }
  0x3c   : > { %411 = vmatmul.f32.gmra.mxu2 %v2176_v3  ;;  %434 = vmatmul.f32.gmra.mxu3 %v2176_v3 }
  0x3d   : > { %441 = vmatpush.msrb.mxu0 %v318_v5 }
  0x3e   : > { %365 = vmatmul.f32.gmra.mxu0 %v2176_v3 }
  0x3f   : > { %442 = vmatpush.msrb.mxu0 %v313_v6 }
  0x41   : > { %443 = vmatpush.msrb.mxu0 %v308_v7 }
  0x43   : > { %444 = vmatpush.msrb.mxu0 %v303_v8 }
  0x45   : > { %445 = vmatpush.msrb.mxu0 %v298_v9 }
  0x47   : > { %446 = vmatpush.msrb.mxu0 %v293_v10 }
  0x49   : > { %447 = vmatpush.msrb.mxu0 %v288_v11 }
  0x4b   : > { %448 = vmatpush.msrb.mxu0 %v283_v12 }
  0x4d   : > { %449 = vmatpush.msrb.mxu0 %v278_v13 }
  0x4f   : > { %450 = vmatpush.msrb.mxu0 %v273_v14 }
  0x51   : > { %451 = vmatpush.msrb.mxu0 %v268_v15 }
  0x53   : > { %452 = vmatpush.msrb.mxu0 %v263_v16 }
  0x55   : > { %453 = vmatpush.msrb.mxu0 %v258_v17 }
  0x56   : > { %454 = vmatmul.f32.vlgmr.msrb.gmra.mxu0 %v2160_v63 }
  0x5e   : > { %457 = vmatmul.f32.gmra.mxu0 %v2176_v3 }
  0xb0   : > { %v386_v18 = vpop.f32.mrf.mxu1 }
  0xb1   : > { %v2239_v34 = vadd.f32 %v386_v18, %v337_v22 }
  0xb3   : > { %v363_v20 = vpop.f32.mrf.mxu0 }
  0xb4   : > { %v364_v32 = vadd.f32 %v363_v20, %v336_v25 }
  0xb7   : > { %v409_v23 = vpop.f32.mrf.mxu2  ;;  %v432_v24 = vpop.f32.mrf.mxu3 }
  0xb8   : > { %v2229_v26 = vadd.f32 %v432_v24, %v339_v21  ;;  %v389_v27 = vpop.f32.mrf.mxu1  ;;  %v410_v36 = vadd.f32 %v409_v23, %v338_v31 }
  0xb9   : > { %v2231_v28 = vadd.f32 %v389_v27, %v337_v22 }
  0xba   : > { %556 = vrot.lane.b32.xlu1 %v2229_v26, %s1870_s16 }
  0xbb   : > { %v366_v29 = vpop.f32.mrf.mxu0  ;;  %653 = vrot.lane.b32.xlu2 %v2231_v28, %s1871_s17 }
  0xbc   : > { %v367_v30 = vadd.f32 %v366_v29, %v336_v25 }
  0xbe   : > { %1630 = vmatpush.xpose.msk.msrb.mxu1 %vm469_vm0, %v367_v30  ;;  %1683 = vmatpush.xpose.msk.msrb.mxu3 %vm469_vm0, %v367_v30 }
  0xbf   : > { %v412_v33 = vpop.f32.mrf.mxu2  ;;  %v435_v37 = vpop.f32.mrf.mxu3 }
  0xc0   : > { %v2241_v35 = vadd.f32 %v412_v33, %v338_v31  ;;  %v436_v38 = vadd.f32 %v435_v37, %v339_v21 }
  0xc2   : > { %564 = vrot.lane.b32.xlu0 %v2241_v35, %s1871_s17  ;;  %467 = vrot.lane.b32.xlu1 %v367_v30, %s1872_s18 }
  0xc3   : > { %1631 = vmatpush.xpose.msk.msrb.mxu1 %vm469_vm0, %v364_v32  ;;  %1684 = vmatpush.xpose.msk.msrb.mxu3 %vm469_vm0, %v364_v32 }
  0xc4   : > { %651 = vrot.lane.b32.xlu2 %v2239_v34, %s1871_s17 }
  0xc7   : > { %758 = vmatpush.msra.mxu1 %v2176_v3 }
  0xc9   : > { %759 = vmatpush.msra.mxu1 %v2160_v63 }
  0xca   : > { %562 = vrot.lane.b32.xlu0 %v410_v36, %s1871_s17  ;;  %774 = vrot.lane.b32.xlu1 %v367_v30, %s1870_s16 }
  0xcc   : > { %772 = vrot.lane.b32.xlu2 %v364_v32, %s1870_s16 }
  0xd2   : > { %558 = vrot.lane.b32.xlu0 %v436_v38, %s1870_s16  ;;  %865 = vrot.lane.b32.xlu1 %v2241_v35, %s1872_s18 }
  0xd3   : > { %v455_v40 = vpop.f32.mrf.mxu0 }
  0xd4   : > { %863 = vrot.lane.b32.xlu2 %v410_v36, %s1872_s18  ;;  %v456_v41 = vadd.f32 %v455_v40, %v340_v39 }
  0xda   : > { %952 = vrot.lane.b32.xlu1 %v456_v41, %s1870_s16  ;;  %465 = vrot.lane.b32.xlu0 %v364_v32, %s1872_s18 }
  0xdb   : > { %v458_v42 = vpop.f32.mrf.mxu0 }
  0xdc   : > { %1079 = vrot.lane.b32.xlu2 %v367_v30, %s1871_s17  ;;  %v459_v43 = vadd.f32 %v458_v42, %v340_v39 }
  0xde   : > { %1654 = vmatpush.xpose.msk.msra.mxu0 %vm469_vm0, %v459_v43 }
  0xe2   : > { %954 = vrot.lane.b32.xlu1 %v459_v43, %s1870_s16  ;;  %859 = vrot.lane.b32.xlu0 %v2229_v26, %s1871_s17 }
  0xe3   : > { %1655 = vmatpush.xpose.msk.msra.mxu0 %vm469_vm0, %v456_v41 }
  0xe4   : > { %1077 = vrot.lane.b32.xlu2 %v364_v32, %s1871_s17 }
  0xea   : > { %1164 = vrot.lane.b32.xlu1 %v2229_v26, %s1872_s18  ;;  %1073 = vrot.lane.b32.xlu0 %v2239_v34, %s1870_s16 }
  0xec   : > { %1257 = vrot.lane.b32.xlu2 %v2231_v28, %s1872_s18 }
  0xf2   : > { %1075 = vrot.lane.b32.xlu1 %v2231_v28, %s1870_s16  ;;  %861 = vrot.lane.b32.xlu0 %v436_v38, %s1871_s17 }
  0xf4   : > { %1166 = vrot.lane.b32.xlu2 %v436_v38, %s1872_s18 }
  0xfa   : > { %1253 = vrot.lane.b32.xlu1 %v2241_v35, %s1870_s16  ;;  %1255 = vrot.lane.b32.xlu0 %v2239_v34, %s1872_s18 }
 0x102   : > { %1251 = vrot.lane.b32.xlu0 %v410_v36, %s1870_s16  ;;  %s1822_s16 = scalar_lea.hbm %s1821_s15, 16 }
 0x103   : > { %p1823_p11 = scmp.ne.s32.totalorder %s1821_s15, %s1822_s16  ;;  %p1828_p1 = scmp.lt.s32.totalorder %s1826_s10, %s1822_s16 }
 0x105   : > { %p1824_p12 = pnand %p1823_p11, %p1948_p5  ;;  %p1829_p2 = por %p1828_p1, %p1827_p0 }
 0x107   : > { %p1825_p13 = pneg %p1824_p12 }
 0x109   : > { %p1830_p3 = pnand %p1829_p2, %p1825_p13 }
 0x115   : > { %v654_v44 = vpop.permute.xlu2 %653 }
 0x116   : > { %1638 = vmatpush.xpose.msk.msra.mxu3 %vm469_vm0, %v654_v44 }
 0x11e   : > { %v652_v45 = vpop.permute.xlu2 %651 }
 0x11f   : > { %1639 = vmatpush.xpose.msk.msra.mxu3 %vm469_vm0, %v652_v45 }
 0x126   : > { %v773_v46 = vpop.permute.xlu2 %772 }
 0x12c   : > { %v557_v47 = vpop.permute.xlu1 %556 }
 0x12e   : > { %v864_v48 = vpop.permute.xlu2 %863 }
 0x134   : > { %v565_v49 = vpop.permute.xlu0 %564  ;;  %v468_v50 = vpop.permute.xlu1 %467 }
 0x135   : > { %1633 = vmatmul.msk.f32.vlgmr.msrb.gmra.mxu3 %vm469_vm0, %v468_v50  ;;  %1634 = vmatpush.xpose.msk.msrb.mxu2 %vm469_vm0, %v565_v49 }
 0x136   : > { %v1080_v51 = vpop.permute.xlu2 %1079 }
 0x13c   : > { %v563_v52 = vpop.permute.xlu0 %562  ;;  %v775_v53 = vpop.permute.xlu1 %774 }
 0x13d   : > { %1635 = vmatpush.xpose.msk.msrb.mxu2 %vm469_vm0, %v563_v52  ;;  %1640 = vmatmul.msk.f32.vlgmr.msra.gmra.mxu3 %vm469_vm0, %v410_v36 }
 0x13e   : > { %v1078_v54 = vpop.permute.xlu2 %1077 }
 0x140   : > { %1636 = vmatmul.msk.f32.vlgmr.msrb.gmra.mxu2 %vm469_vm0, %v557_v47 }
 0x141   : > { %1646 = vmatpush.xpose.msk.msra.mxu2 %vm469_vm0, %v775_v53 }
 0x144   : > { %v559_v55 = vpop.permute.xlu0 %558  ;;  %v866_v56 = vpop.permute.xlu1 %865 }
 0x145   : > { %1647 = vmatpush.xpose.msk.msra.mxu2 %vm469_vm0, %v773_v46  ;;  %1641 = vmatmul.msk.f32.gmra.mxu3 %vm469_vm0, %v2241_v35 }
 0x146   : > { %1650 = vmatpush.xpose.msk.msrb.mxu3 %vm469_vm0, %v866_v56  ;;  %v1258_v57 = vpop.permute.xlu2 %1257 }
 0x147   : > { %1670 = vmatpush.xpose.msk.msrb.mxu0 %vm469_vm0, %v1258_v57 }
 0x148   : > { %1637 = vmatmul.msk.f32.gmra.mxu2 %vm469_vm0, %v559_v55 }
 0x149   : > { %1685 = vmatpush.xpose.msk.msrb.mxu2 %vm469_vm0, %v459_v43 }
 0x14a   : > { %1651 = vmatpush.xpose.msk.msrb.mxu3 %vm469_vm0, %v864_v48 }
 0x14c   : > { %v953_v58 = vpop.permute.xlu1 %952  ;;  %v466_v59 = vpop.permute.xlu0 %465 }
 0x14d   : > { %1686 = vmatpush.xpose.msk.msrb.mxu2 %vm469_vm0, %v456_v41  ;;  %1632 = vmatmul.msk.f32.vlgmr.msrb.gmra.mxu1 %vm469_vm0, %v466_v59 }
 0x14e   : > { %1666 = vmatpush.xpose.msk.msra.mxu3 %vm469_vm0, %v436_v38  ;;  %1656 = vmatmul.msk.f32.vlgmr.msra.gmra.mxu0 %vm469_vm0, %v953_v58  ;;  %v1167_v4 = vpop.permute.xlu2 %1166 }
 0x14f   : > { %1059 = vmatpush.msrb.mxu1 %v2176_v3 }
 0x150   : > { %1648 = vmatmul.msk.f32.vlgmr.msra.gmra.mxu2 %vm469_vm0, %v2239_v34 }
 0x151   : > { %1060 = vmatpush.msrb.mxu1 %v2160_v63  ;;  %1662 = vmatpush.xpose.msk.msra.mxu2 %vm469_vm0, %v1080_v51 }
 0x152   : > { %1667 = vmatpush.xpose.msk.msra.mxu3 %vm469_vm0, %v2229_v26 }
 0x154   : > { %v860_v60 = vpop.permute.xlu0 %859  ;;  %v955_v61 = vpop.permute.xlu1 %954 }
 0x155   : > { %1663 = vmatpush.xpose.msk.msra.mxu2 %vm469_vm0, %v1078_v54  ;;  %1652 = vmatmul.msk.f32.vlgmr.msrb.gmra.mxu3 %vm469_vm0, %v860_v60 }
 0x158   : > { %1649 = vmatmul.msk.f32.gmra.mxu2 %vm469_vm0, %v2231_v28 }
 0x15c   : > { %v1074_v62 = vpop.permute.xlu0 %1073  ;;  %v1165_v1 = vpop.permute.xlu1 %1164 }
 0x160   : > { %1657 = vmatmul.msk.f32.vlgmr.msrb.gmra.mxu2 %vm469_vm0, %v955_v61 }
 0x164   : > { %v862_v0 = vpop.permute.xlu0 %861  ;;  %v1076_v2 = vpop.permute.xlu1 %1075 }
 0x165   : > { %1653 = vmatmul.msk.f32.gmra.mxu3 %vm469_vm0, %v862_v0 }
 0x168   : > { %1664 = vmatmul.msk.f32.vlgmr.msra.gmra.mxu2 %vm469_vm0, %v1074_v62 }
 0x16c   : > { %v1256_v63 = vpop.permute.xlu0 %1255  ;;  %v1254_v6 = vpop.permute.xlu1 %1253 }
 0x16d   : > { %1668 = vmatmul.msk.f32.vlgmr.msra.gmra.mxu3 %vm469_vm0, %v1165_v1  ;;  %1671 = vmatpush.xpose.msk.msrb.mxu0 %vm469_vm0, %v1256_v63 }
 0x170   : > { %1665 = vmatmul.msk.f32.gmra.mxu2 %vm469_vm0, %v1076_v2 }
 0x174   : > { %v1252_v5 = vpop.permute.xlu0 %1251 }
 0x175   : > { %1669 = vmatmul.msk.f32.gmra.mxu3 %vm469_vm0, %v1167_v4  ;;  %1672 = vmatmul.msk.f32.vlgmr.msrb.gmra.mxu0 %vm469_vm0, %v1252_v5 }
 0x17d   : > { %1673 = vmatmul.msk.f32.gmra.mxu0 %vm469_vm0, %v1254_v6 }
 0x1b8   : > { %v498_v7 = vpop.f32.mrf.mxu3 }
 0x1b9   : > { %v2341_v23 = vmul.f32 0.03125, %v498_v7 }
 0x1bb   : > { %v507_v27 = vsel %vm503_vm1, %v2341_v23, -inf }
 0x1c0   : > { %v680_v8 = vpop.f32.mrf.mxu3 }
 0x1c1   : > { %v2323_v9 = vmul.f32 0.03125, %v680_v8 }
 0x1c3   : > { %v591_v10 = vpop.f32.mrf.mxu2  ;;  %v688_v11 = vsel %vm503_vm1, %v2323_v9, -inf }
 0x1c4   : > { %v2327_v12 = vmul.f32 0.03125, %v591_v10  ;;  %689 = vmax.xlane.f32.xlu1 %v688_v11 }
 0x1c6   : > { %v599_v13 = vsel %vm503_vm1, %v2327_v12, -inf }
 0x1c7   : > { %600 = vmax.xlane.f32.xlu0 %v599_v13 }
 0x1c8   : > { %v683_v14 = vpop.f32.mrf.mxu3 }
 0x1c9   : > { %v2331_v15 = vmul.f32 0.03125, %v683_v14 }
 0x1ca   : > { %v495_v16 = vpop.f32.mrf.mxu1 }
 0x1cb   : > { %v2333_v17 = vmul.f32 0.03125, %v495_v16  ;;  %v594_v18 = vpop.f32.mrf.mxu2  ;;  %v981_v20 = vpop.f32.mrf.mxu0  ;;  %v691_v21 = vsel %vm503_vm1, %v2331_v15, -inf }
 0x1cc   : > { %v2339_v22 = vmul.f32 0.03125, %v981_v20  ;;  %v2351_v29 = vmul.f32 0.03125, %v594_v18 }
 0x1cd   : > { %v504_v19 = vsel %vm503_vm1, %v2333_v17, -inf }
 0x1ce   : > { %505 = vmax.xlane.f32.xlu2 %v504_v19  ;;  %v989_v26 = vsel %vm503_vm1, %v2339_v22, -inf  ;;  %v602_v32 = vsel %vm503_vm1, %v2351_v29, -inf }
 0x1cf   : > { %692 = vmax.xlane.f32.xlu0 %v691_v21 }
 0x1d3   : > { %v801_v24 = vpop.f32.mrf.mxu2 }
 0x1d4   : > { %v2343_v25 = vmul.f32 0.03125, %v801_v24 }
 0x1d6   : > { %508 = vmax.xlane.f32.xlu2 %v507_v27  ;;  %v809_v28 = vsel %vm503_vm1, %v2343_v25, -inf }
 0x1d7   : > { %810 = vmax.xlane.f32.xlu1 %v809_v28  ;;  %990 = vmax.xlane.f32.xlu0 %v989_v26 }
 0x1d8   : > { %v892_v33 = vpop.f32.mrf.mxu3 }
 0x1d9   : > { %v2359_v35 = vmul.f32 0.03125, %v892_v33 }
 0x1db   : > { %v804_v30 = vpop.f32.mrf.mxu2  ;;  %v900_v38 = vsel %vm503_vm1, %v2359_v35, -inf }
 0x1dc   : > { %v2353_v31 = vmul.f32 0.03125, %v804_v30 }
 0x1de   : > { %603 = vmax.xlane.f32.xlu2 %v602_v32  ;;  %v812_v34 = vsel %vm503_vm1, %v2353_v31, -inf }
 0x1df   : > { %813 = vmax.xlane.f32.xlu1 %v812_v34 }
 0x1e3   : > { %v984_v36 = vpop.f32.mrf.mxu2 }
 0x1e4   : > { %v2361_v37 = vmul.f32 0.03125, %v984_v36 }
 0x1e6   : > { %901 = vmax.xlane.f32.xlu2 %v900_v38  ;;  %v992_v39 = vsel %vm503_vm1, %v2361_v37, -inf }
 0x1e7   : > { %993 = vmax.xlane.f32.xlu0 %v992_v39 }
 0x1e8   : > { %v895_v40 = vpop.f32.mrf.mxu3 }
 0x1e9   : > { %v2367_v41 = vmul.f32 0.03125, %v895_v40 }
 0x1eb   : > { %v1106_v42 = vpop.f32.mrf.mxu2  ;;  %v903_v44 = vsel %vm503_vm1, %v2367_v41, -inf }
 0x1ec   : > { %v2369_v43 = vmul.f32 0.03125, %v1106_v42 }
 0x1ee   : > { %904 = vmax.xlane.f32.xlu2 %v903_v44  ;;  %v1114_v45 = vsel %vm503_vm1, %v2369_v43, -inf }
 0x1ef   : > { %1115 = vmax.xlane.f32.xlu1 %v1114_v45 }
 0x1f0   : > { %v1193_v46 = vpop.f32.mrf.mxu3 }
 0x1f1   : > { %v2375_v47 = vmul.f32 0.03125, %v1193_v46 }
 0x1f2   : > { %v1284_v48 = vpop.f32.mrf.mxu0 }
 0x1f3   : > { %v2377_v49 = vmul.f32 0.03125, %v1284_v48  ;;  %v1109_v50 = vpop.f32.mrf.mxu2  ;;  %v1201_v53 = vsel %vm503_vm1, %v2375_v47, -inf }
 0x1f4   : > { %v2379_v51 = vmul.f32 0.03125, %v1109_v50 }
 0x1f5   : > { %v1292_v52 = vsel %vm503_vm1, %v2377_v49, -inf }
 0x1f6   : > { %1293 = vmax.xlane.f32.xlu0 %v1292_v52  ;;  %1202 = vmax.xlane.f32.xlu2 %v1201_v53  ;;  %v1117_v54 = vsel %vm503_vm1, %v2379_v51, -inf }
 0x1f7   : > { %1118 = vmax.xlane.f32.xlu1 %v1117_v54 }
 0x1f8   : > { %v1196_v55 = vpop.f32.mrf.mxu3 }
 0x1f9   : > { %v2387_v56 = vmul.f32 0.03125, %v1196_v55 }
 0x1fa   : > { %v1287_v57 = vpop.f32.mrf.mxu0 }
 0x1fb   : > { %v2389_v58 = vmul.f32 0.03125, %v1287_v57  ;;  %v1204_v60 = vsel %vm503_vm1, %v2387_v56, -inf }
 0x1fd   : > { %v1295_v59 = vsel %vm503_vm1, %v2389_v58, -inf }
 0x1fe   : > { %1296 = vmax.xlane.f32.xlu0 %v1295_v59  ;;  %1205 = vmax.xlane.f32.xlu2 %v1204_v60 }
 0x237   : > { %v690_v61 = vpop.xlane.xlu1 %689 }
 0x238   : > { %v694_v62 = vsub.f32 %v2323_v9, %v690_v61 }
 0x23a   : > { %v696_v0 = vmul.f32 1.442695, %v694_v62  ;;  %v601_v1 = vpop.xlane.xlu0 %600 }
 0x23b   : > { %v605_v63 = vsub.f32 %v2327_v12, %v601_v1 }
 0x23c   : > { %1732 = vpow2.f32 %v696_v0 }
 0x23d   : > { %v607_v2 = vmul.f32 1.442695, %v605_v63 }
 0x23f   : > { %1734 = vpow2.f32 %v607_v2 }
 0x241   : > { %v506_v4 = vpop.xlane.xlu2 %505 }
 0x242   : > { %v2397_v5 = vpop.eup %1732  ;;  %v510_v6 = vsub.f32 %v2333_v17, %v506_v4  ;;  %v693_v7 = vpop.xlane.xlu0 %692 }
 0x243   : > { %v695_v8 = vsub.f32 %v2331_v15, %v693_v7  ;;  %v700_v10 = vsel %vm503_vm1, %v2397_v5, 0.0 }
 0x244   : > { %v512_v11 = vmul.f32 1.442695, %v510_v6  ;;  %701 = vadd.xlane.f32.xlu0 %v700_v10 }
 0x245   : > { %v2403_v9 = vpop.eup %1734  ;;  %v698_v13 = vmul.f32 1.442695, %v695_v8 }
 0x246   : > { %1736 = vpow2.f32 %v512_v11  ;;  %v611_v12 = vsel %vm503_vm1, %v2403_v9, 0.0 }
 0x247   : > { %1738 = vpow2.f32 %v698_v13  ;;  %612 = vadd.xlane.f32.xlu2 %v611_v12 }
 0x249   : > { %v509_v14 = vpop.xlane.xlu2 %508 }
 0x24a   : > { %v511_v16 = vsub.f32 %v2341_v23, %v509_v14  ;;  %v811_v17 = vpop.xlane.xlu1 %810  ;;  %v991_v18 = vpop.xlane.xlu0 %990 }
 0x24b   : > { %v995_v15 = vsub.f32 %v2339_v22, %v991_v18  ;;  %v815_v21 = vsub.f32 %v2343_v25, %v811_v17 }
 0x24c   : > { %v2409_v19 = vpop.eup %1736  ;;  %v514_v20 = vmul.f32 1.442695, %v511_v16 }
 0x24d   : > { %v2412_v24 = vpop.eup %1738  ;;  %v997_v26 = vmul.f32 1.442695, %v995_v15  ;;  %v516_v27 = vsel %vm503_vm1, %v2409_v19, 0.0  ;;  %v817_v28 = vmul.f32 1.442695, %v815_v21 }
 0x24e   : > { %1740 = vpow2.f32 %v514_v20  ;;  %517 = vadd.xlane.f32.xlu1 %v516_v27  ;;  %v703_v23 = vsel %vm503_vm1, %v2412_v24, 0.0 }
 0x24f   : > { %704 = vadd.xlane.f32.xlu0 %v703_v23  ;;  %1742 = vpow2.f32 %v997_v26 }
 0x250   : > { %1744 = vpow2.f32 %v817_v28 }
 0x251   : > { %v604_v22 = vpop.xlane.xlu2 %603 }
 0x252   : > { %v606_v30 = vsub.f32 %v2351_v29, %v604_v22  ;;  %v814_v32 = vpop.xlane.xlu1 %813 }
 0x253   : > { %v816_v34 = vsub.f32 %v2353_v31, %v814_v32 }
 0x254   : > { %v2419_v33 = vpop.eup %1740  ;;  %v609_v25 = vmul.f32 1.442695, %v606_v30 }
 0x255   : > { %v519_v36 = vsel %vm503_vm1, %v2419_v33, 0.0  ;;  %v2424_v38 = vpop.eup %1742  ;;  %v819_v40 = vmul.f32 1.442695, %v816_v34 }
 0x256   : > { %1746 = vpow2.f32 %v609_v25  ;;  %520 = vadd.xlane.f32.xlu1 %v519_v36  ;;  %v1001_v39 = vsel %vm503_vm1, %v2424_v38, 0.0  ;;  %v2428_v42 = vpop.eup %1744 }
 0x257   : > { %1002 = vadd.xlane.f32.xlu0 %v1001_v39  ;;  %1748 = vpow2.f32 %v819_v40  ;;  %v821_v52 = vsel %vm503_vm1, %v2428_v42, 0.0 }
 0x259   : > { %v902_v29 = vpop.xlane.xlu2 %901 }
 0x25a   : > { %v906_v44 = vsub.f32 %v2359_v35, %v902_v29  ;;  %v994_v45 = vpop.xlane.xlu0 %993 }
 0x25b   : > { %v996_v31 = vsub.f32 %v2361_v37, %v994_v45 }
 0x25c   : > { %v2432_v46 = vpop.eup %1746  ;;  %v908_v48 = vmul.f32 1.442695, %v906_v44 }
 0x25d   : > { %v999_v50 = vmul.f32 1.442695, %v996_v31  ;;  %v614_v53 = vsel %vm503_vm1, %v2432_v46, 0.0  ;;  %v2438_v35 = vpop.eup %1748 }
 0x25e   : > { %1750 = vpow2.f32 %v908_v48  ;;  %822 = vadd.xlane.f32.xlu1 %v821_v52  ;;  %615 = vadd.xlane.f32.xlu2 %v614_v53  ;;  %v824_v0 = vsel %vm503_vm1, %v2438_v35, 0.0 }
 0x25f   : > { %1752 = vpow2.f32 %v999_v50 }
 0x261   : > { %v905_v54 = vpop.xlane.xlu2 %904 }
 0x262   : > { %v907_v37 = vsub.f32 %v2367_v41, %v905_v54  ;;  %v1116_v55 = vpop.xlane.xlu1 %1115 }
 0x263   : > { %v1120_v57 = vsub.f32 %v2369_v43, %v1116_v55 }
 0x264   : > { %v2442_v59 = vpop.eup %1750  ;;  %v910_v60 = vmul.f32 1.442695, %v907_v37 }
 0x265   : > { %v2444_v61 = vpop.eup %1752  ;;  %v1122_v62 = vmul.f32 1.442695, %v1120_v57  ;;  %v912_v1 = vsel %vm503_vm1, %v2442_v59, 0.0 }
 0x266   : > { %1754 = vpow2.f32 %v910_v60  ;;  %825 = vadd.xlane.f32.xlu1 %v824_v0  ;;  %913 = vadd.xlane.f32.xlu2 %v912_v1  ;;  %v1004_v41 = vsel %vm503_vm1, %v2444_v61, 0.0 }
 0x267   : > { %1756 = vpow2.f32 %v1122_v62  ;;  %1005 = vadd.xlane.f32.xlu0 %v1004_v41 }
 0x269   : > { %v1294_v43 = vpop.xlane.xlu0 %1293  ;;  %v1203_v63 = vpop.xlane.xlu2 %1202 }
 0x26a   : > { %v1298_v2 = vsub.f32 %v2377_v49, %v1294_v43  ;;  %v1207_v4 = vsub.f32 %v2375_v47, %v1203_v63  ;;  %v1119_v6 = vpop.xlane.xlu1 %1118 }
 0x26b   : > { %v1121_v7 = vsub.f32 %v2379_v51, %v1119_v6 }
 0x26c   : > { %v2455_v8 = vpop.eup %1754  ;;  %v1300_v10 = vmul.f32 1.442695, %v1298_v2  ;;  %v1209_v11 = vmul.f32 1.442695, %v1207_v4 }
 0x26d   : > { %v2457_v13 = vpop.eup %1756  ;;  %v1124_v12 = vmul.f32 1.442695, %v1121_v7  ;;  %v915_v14 = vsel %vm503_vm1, %v2455_v8, 0.0 }
 0x26e   : > { %1758 = vpow2.f32 %v1300_v10  ;;  %916 = vadd.xlane.f32.xlu2 %v915_v14  ;;  %v1126_v49 = vsel %vm503_vm1, %v2457_v13, 0.0 }
 0x26f   : > { %1760 = vpow2.f32 %v1209_v11  ;;  %1127 = vadd.xlane.f32.xlu1 %v1126_v49 }
 0x270   : > { %1762 = vpow2.f32 %v1124_v12 }
 0x271   : > { %v1297_v47 = vpop.xlane.xlu0 %1296  ;;  %v1206_v51 = vpop.xlane.xlu2 %1205 }
 0x272   : > { %v1299_v16 = vsub.f32 %v2389_v58, %v1297_v47  ;;  %v1208_v17 = vsub.f32 %v2387_v56, %v1206_v51 }
 0x274   : > { %v2465_v18 = vpop.eup %1758  ;;  %v1302_v15 = vmul.f32 1.442695, %v1299_v16  ;;  %v1211_v20 = vmul.f32 1.442695, %v1208_v17 }
 0x275   : > { %v2467_v21 = vpop.eup %1760  ;;  %v1304_v26 = vsel %vm503_vm1, %v2465_v18, 0.0 }
 0x276   : > { %v2471_v27 = vpop.eup %1762  ;;  %1764 = vpow2.f32 %v1302_v15  ;;  %1305 = vadd.xlane.f32.xlu0 %v1304_v26  ;;  %v1213_v23 = vsel %vm503_vm1, %v2467_v21, 0.0 }
 0x277   : > { %1766 = vpow2.f32 %v1211_v20  ;;  %1214 = vadd.xlane.f32.xlu2 %v1213_v23  ;;  %v1129_v56 = vsel %vm503_vm1, %v2471_v27, 0.0 }
 0x278   : > { %1130 = vadd.xlane.f32.xlu1 %v1129_v56 }
 0x27c   : > { %v2477_v58 = vpop.eup %1764 }
 0x27d   : > { %v2479_v28 = vpop.eup %1766  ;;  %v1307_v22 = vsel %vm503_vm1, %v2477_v58, 0.0 }
 0x27e   : > { %1308 = vadd.xlane.f32.xlu0 %v1307_v22  ;;  %v1216_v30 = vsel %vm503_vm1, %v2479_v28, 0.0  ;;  %v461_v22 = vld [vmem:[%s3232_s5] sm:$0xff] }
 0x27f   : > { %1217 = vadd.xlane.f32.xlu2 %v1216_v30 }
 0x2b7   : > { %v2485_v32 = vpop.xlane.xlu0 %701 }
 0x2b8   : > { %vm711_vm9 = vweird.f32 %v2485_v32  ;;  %v715_v47 = vand.u32 2147483647, %v2485_v32  ;;  %v717_v51 = vand.u32 2147483648, %v2485_v32 }
 0x2ba   : > { %v613_v25 = vpop.xlane.xlu2 %612  ;;  %vm716_vm13 = vcmp.eq.f32.partialorder %v715_v47, 8.507059e+37 }
 0x2bb   : > { %1768 = vrcp.f32 %v613_v25  ;;  %vm622_vm3 = vweird.f32 %v613_v25  ;;  %v626_v43 = vand.u32 2147483647, %v613_v25  ;;  %v628_v4 = vand.u32 2147483648, %v613_v25 }
 0x2bc   : > { %1770 = vrcp.f32 %v2485_v32 }
 0x2bd   : > { %v629_v56 = vor.u32 1.1754944e-38, %v628_v4  ;;  %vm627_vm12 = vcmp.eq.f32.partialorder %v626_v43, 8.507059e+37 }
 0x2c1   : > { %v2488_v34 = vpop.eup %1768  ;;  %v518_v36 = vpop.xlane.xlu1 %517 }
 0x2c2   : > { %1772 = vrcp.f32 %v518_v36  ;;  %v2490_v39 = vpop.xlane.xlu0 %704  ;;  %v2492_v40 = vpop.eup %1770  ;;  %v618_v29 = vmul.f32 %v2488_v34, %v613_v25  ;;  %v533_v55 = vand.u32 2147483648, %v518_v36  ;;  %v531_v60 = vand.u32 2147483647, %v518_v36 }
 0x2c3   : > { %v707_v44 = vmul.f32 %v2492_v40, %v2485_v32  ;;  %1774 = vrcp.f32 %v2490_v39  ;;  %vm527_vm4 = vweird.f32 %v518_v36  ;;  %vm623_vm5 = vweird.f32 %v2488_v34 }
 0x2c4   : > { %v619_v31 = vsub.f32 1.0, %v618_v29  ;;  %v534_v63 = vor.u32 1.1754944e-38, %v533_v55  ;;  %vm712_vm7 = vweird.f32 %v2492_v40  ;;  %vm532_vm8 = vcmp.eq.f32.partialorder %v531_v60, 8.507059e+37  ;;  %vm2529_vm10 = vmor %vm622_vm3, %vm623_vm5 }
 0x2c5   : > { %v708_v52 = vsub.f32 1.0, %v707_v44  ;;  %v731_v17 = vand.u32 2147483648, %v2490_v39  ;;  %vm2543_vm11 = vmor %vm711_vm9, %vm712_vm7  ;;  %v718_v25 = vor.u32 1.1754944e-38, %v717_v51  ;;  %vm725_vm14 = vweird.f32 %v2490_v39 }
 0x2c6   : > { %v620_v37 = vmul.f32 %v2488_v34, %v619_v31  ;;  %v729_v44 = vand.u32 2147483647, %v2490_v39 }
 0x2c7   : > { %v709_v62 = vmul.f32 %v2492_v40, %v708_v52 }
 0x2c8   : > { %v1773_v45 = vpop.eup %1772  ;;  %v621_v41 = vadd.f32 %v2488_v34, %v620_v37  ;;  %vm2582_vm0 = vcmp.eq.f32.partialorder %v729_v44, 8.507059e+37 }
 0x2c9   : > { %v523_v48 = vmul.f32 %v1773_v45, %v518_v36  ;;  %v2498_v50 = vpop.xlane.xlu1 %520  ;;  %vm528_vm2 = vweird.f32 %v1773_v45  ;;  %v2506_v0 = vpop.eup %1774  ;;  %v710_v12 = vadd.f32 %v2492_v40, %v709_v62 }
 0x2ca   : > { %1776 = vrcp.f32 %v2498_v50  ;;  %v2501_v54 = vpop.xlane.xlu0 %1002  ;;  %vm529_vm6 = vmor %vm527_vm4, %vm528_vm2  ;;  %v721_v49 = vmul.f32 %v2506_v0, %v2490_v39  ;;  %v625_v15 = vsel %vm2529_vm10, %v2488_v34, %v621_v41  ;;  %vm726_vm15 = vweird.f32 %v2506_v0 }
 0x2cb   : > { %v524_v53 = vsub.f32 1.0, %v523_v48  ;;  %1778 = vrcp.f32 %v2501_v54  ;;  %v630_v34 = vsel %vm627_vm12, %v629_v56, %v625_v15  ;;  %v1016_v41 = vand.u32 2147483647, %v2501_v54 }
 0x2cc   : > { %v722_v32 = vsub.f32 1.0, %v721_v49  ;;  %v645_v60 = vmul.f32 %v2403_v9, %v630_v34  ;;  %v1018_v43 = vand.u32 2147483648, %v2501_v54  ;;  %vm541_vm2 = vweird.f32 %v2498_v50 }
 0x2cd   : > { %v525_v57 = vmul.f32 %v1773_v45, %v524_v53  ;;  %v545_v53 = vand.u32 2147483647, %v2498_v50  ;;  %vm1012_vm3 = vweird.f32 %v2501_v54  ;;  %vm2591_vm4 = vcmp.eq.f32.partialorder %v1016_v41, 8.507059e+37 }
 0x2ce   : > { %v723_v62 = vmul.f32 %v2506_v0, %v722_v32  ;;  %v1019_v15 = vor.u32 1.1754944e-38, %v1018_v43 }
 0x2cf   : > { %v526_v1 = vadd.f32 %v1773_v45, %v525_v57 }
 0x2d0   : > { %v2510_v2 = vpop.eup %1776  ;;  %v724_v51 = vadd.f32 %v2506_v0, %v723_v62 }
 0x2d1   : > { %v530_v6 = vsel %vm529_vm6, %v1773_v45, %v526_v1  ;;  %v2513_v7 = vpop.xlane.xlu1 %822  ;;  %v2515_v10 = vpop.xlane.xlu2 %615  ;;  %v537_v30 = vmul.f32 %v2510_v2, %v2498_v50  ;;  %v2559_v45 = vor.u32 1.1754944e-38, %v731_v17  ;;  %v547_v1 = vand.u32 2147483648, %v2498_v50 }
 0x2d2   : > { %v2517_v11 = vpop.eup %1778  ;;  %v535_v14 = vsel %vm532_vm8, %v534_v63, %v530_v6  ;;  %1780 = vrcp.f32 %v2513_v7  ;;  %v836_v47 = vand.u32 2147483647, %v2513_v7  ;;  %vm542_vm5 = vweird.f32 %v2510_v2  ;;  %vm2612_vm8 = vmor %vm725_vm14, %vm726_vm15 }
 0x2d3   : > { %v550_v20 = vmul.f32 %v2409_v19, %v535_v14  ;;  %v1008_v26 = vmul.f32 %v2517_v11, %v2501_v54  ;;  %1782 = vrcp.f32 %v2515_v10  ;;  %v714_v19 = vsel %vm2543_vm11, %v2492_v40, %v710_v12  ;;  %vm2654_vm14 = vmor %vm541_vm2, %vm542_vm5 }
 0x2d4   : > { %v719_v48 = vsel %vm716_vm13, %v718_v25, %v714_v19  ;;  %v538_v52 = vsub.f32 1.0, %v537_v30  ;;  %vm2596_vm6 = vcmp.eq.f32.partialorder %v545_v53, 8.507059e+37  ;;  %vm1013_vm7 = vweird.f32 %v2517_v11 }
 0x2d5   : > { %v552_v29 = vadd.f32 %v550_v20, %v461_v22  ;;  %v1009_v31 = vsub.f32 1.0, %v1008_v26  ;;  %v734_v6 = vmul.f32 %v2397_v5, %v719_v48  ;;  %v548_v5 = vor.u32 1.1754944e-38, %v547_v1  ;;  %vm2640_vm12 = vmor %vm1012_vm3, %vm1013_vm7 }
 0x2d6   : > { %v539_v49 = vmul.f32 %v2510_v2, %v538_v52  ;;  %v838_v22 = vand.u32 2147483648, %v2513_v7  ;;  %vm832_vm9 = vweird.f32 %v2513_v7  ;;  %vm2618_vm10 = vcmp.eq.f32.partialorder %v836_v47, 8.507059e+37 }
 0x2d7   : > { %v1010_v12 = vmul.f32 %v2517_v11, %v1009_v31  ;;  %v647_v9 = vadd.f32 %v645_v60, %v552_v29  ;;  %v640_v29 = vand.u32 2147483647, %v2515_v10  ;;  %vm636_vm11 = vweird.f32 %v2515_v10 }
 0x2d8   : > { %v2555_v36 = vpop.eup %1780  ;;  %v540_v25 = vadd.f32 %v2510_v2, %v539_v49  ;;  %v642_v39 = vand.u32 2147483648, %v2515_v10  ;;  %v728_v52 = vsel %vm2612_vm8, %v2506_v0, %v724_v51  ;;  %v839_v1 = vor.u32 1.1754944e-38, %v838_v22 }
 0x2d9   : > { %v828_v40 = vmul.f32 %v2555_v36, %v2513_v7  ;;  %v2564_v37 = vpop.xlane.xlu1 %825  ;;  %v2566_v55 = vpop.xlane.xlu2 %913  ;;  %v1011_v56 = vadd.f32 %v2517_v11, %v1010_v12  ;;  %v736_v30 = vadd.f32 %v734_v6, %v647_v9  ;;  %vm833_vm13 = vweird.f32 %v2555_v36 }
 0x2da   : > { %v2568_v57 = vpop.eup %1782  ;;  %1784 = vrcp.f32 %v2564_v37  ;;  %v2601_v23 = vpop.xlane.xlu0 %1005  ;;  %vm2667_vm15 = vcmp.eq.f32.partialorder %v640_v29, 8.507059e+37  ;;  %v852_v43 = vand.u32 2147483648, %v2564_v37  ;;  %vm2681_vm2 = vmor %vm832_vm9, %vm833_vm13  ;;  %v850_v6 = vand.u32 2147483647, %v2564_v37 }
 0x2db   : > { %v829_v63 = vsub.f32 1.0, %v828_v40  ;;  %v632_v4 = vmul.f32 %v2568_v57, %v2515_v10  ;;  %1786 = vrcp.f32 %v2566_v55  ;;  %1642 = vmatmul.msk.f32.vlgmr.msra.gmra.mxu1 %vm503_vm1, %v736_v30  ;;  %v1015_v0 = vsel %vm2640_vm12, %v2517_v11, %v1011_v56  ;;  %v2674_v11 = vld [vmem:[%s2142_s11] sm:$0xff] }
 0x2dc   : > { %1788 = vrcp.f32 %v2601_v23  ;;  %1362 = vmatpush.msra.mxu1 %v2176_v3  ;;  %v544_v3 = vsel %vm2654_vm14, %v2510_v2, %v540_v25  ;;  %vm637_vm3 = vweird.f32 %v2568_v57  ;;  %v643_v2 = vor.u32 1.1754944e-38, %v642_v39 }
 0x2dd   : > { %v830_v20 = vmul.f32 %v2555_v36, %v829_v63  ;;  %v633_v26 = vsub.f32 1.0, %v632_v4  ;;  %v733_v12 = vsel %vm2582_vm0, %v2559_v45, %v728_v52  ;;  %v1020_v9 = vsel %vm2591_vm4, %v1019_v15, %v1015_v0  ;;  %vm2721_vm0 = vmor %vm636_vm11, %vm637_vm3 }
 0x2de   : > { %1363 = vmatpush.msra.mxu1 %v2674_v11  ;;  %v549_v45 = vsel %vm2596_vm6, %v548_v5, %v544_v3  ;;  %v2703_v14 = vor.u32 1.1754944e-38, %v852_v43  ;;  %v1032_v15 = vand.u32 2147483648, %v2601_v23  ;;  %v2713_v30 = vmul.f32 %v2424_v38, %v1020_v9 }
 0x2df   : > { %v831_v40 = vadd.f32 %v2555_v36, %v830_v20  ;;  %v634_v60 = vmul.f32 %v2568_v57, %v633_v26  ;;  %v927_v26 = vand.u32 2147483647, %v2566_v55  ;;  %vm846_vm4 = vweird.f32 %v2564_v37 }
 0x2e0   : > { %v2606_v19 = vpop.eup %1784  ;;  %vm923_vm6 = vweird.f32 %v2566_v55  ;;  %v551_v34 = vmul.f32 %v2419_v33, %v549_v45  ;;  %v1030_v53 = vand.u32 2147483647, %v2601_v23  ;;  %vm2796_vm12 = vcmp.eq.f32.partialorder %v850_v6, 8.507059e+37 }
 0x2e1   : > { %v2623_v44 = vpop.xlane.xlu2 %916  ;;  %v2625_v31 = vpop.eup %1786  ;;  %v842_v41 = vmul.f32 %v2606_v19, %v2564_v37  ;;  %v835_v7 = vsel %vm2681_vm2, %v2555_v36, %v831_v40  ;;  %v635_v49 = vadd.f32 %v2568_v57, %v634_v60  ;;  %v929_v36 = vand.u32 2147483648, %v2566_v55  ;;  %v462_v40 = vld [vmem:[%s3232_s5 + $0x8] sm:$0xff] }
 0x2e2   : > { %v2631_v48 = vpop.xlane.xlu1 %1127  ;;  %v919_v62 = vmul.f32 %v2625_v31, %v2566_v55  ;;  %v2697_v51 = vpop.eup %1788  ;;  %vm924_vm5 = vweird.f32 %v2625_v31  ;;  %v840_v32 = vsel %vm2618_vm10, %v839_v1, %v835_v7  ;;  %vm928_vm8 = vcmp.eq.f32.partialorder %v927_v26, 8.507059e+37 }
 0x2e3   : > { %1790 = vrcp.f32 %v2631_v48  ;;  %v843_v20 = vsub.f32 1.0, %v842_v41  ;;  %vm2732_vm7 = vmor %vm923_vm6, %vm924_vm5  ;;  %v1022_v10 = vmul.f32 %v2697_v51, %v2601_v23  ;;  %v639_v55 = vsel %vm2721_vm0, %v2568_v57, %v635_v49 }
 0x2e4   : > { %v920_v63 = vsub.f32 1.0, %v919_v62  ;;  %1792 = vrcp.f32 %v2623_v44  ;;  %v855_v33 = vmul.f32 %v2428_v42, %v840_v32  ;;  %vm847_vm9 = vweird.f32 %v2606_v19 }
 0x2e5   : > { %v844_v39 = vmul.f32 %v2606_v19, %v843_v20  ;;  %v930_v57 = vor.u32 1.1754944e-38, %v929_v36  ;;  %v2756_v60 = vor.u32 1.1754944e-38, %v1032_v15  ;;  %v644_v1 = vsel %vm2667_vm15, %v643_v2, %v639_v55  ;;  %vm2790_vm11 = vmor %vm846_vm4, %vm847_vm9 }
 0x2e6   : > { %v921_v47 = vmul.f32 %v2625_v31, %v920_v63  ;;  %v1023_v41 = vsub.f32 1.0, %v1022_v10  ;;  %v553_v3 = vadd.f32 %v551_v34, %v462_v40  ;;  %v646_v43 = vmul.f32 %v2432_v46, %v644_v1 }
 0x2e7   : > { %v2772_v4 = vadd.f32 %v2606_v19, %v844_v39  ;;  %v941_v9 = vand.u32 2147483647, %v2623_v44  ;;  %v943_v7 = vand.u32 2147483648, %v2623_v44  ;;  %v1141_v2 = vand.u32 2147483647, %v2631_v48 }
 0x2e8   : > { %v922_v16 = vadd.f32 %v2625_v31, %v921_v47  ;;  %v648_v49 = vadd.f32 %v646_v43, %v553_v3  ;;  %v735_v47 = vmul.f32 %v2412_v24, %v733_v12  ;;  %vm1026_vm10 = vweird.f32 %v2601_v23  ;;  %v1412_v23 = vld [vmem:[%s3230_s3 + $0xf8] sm:$0xff] }
 0x2e9   : > { %v2708_v56 = vpop.xlane.xlu0 %1305  ;;  %v2710_v22 = vpop.eup %1790  ;;  %vm1027_vm13 = vweird.f32 %v2697_v51  ;;  %v1143_v12 = vand.u32 2147483648, %v2631_v48  ;;  %v849_v5 = vsel %vm2790_vm11, %v2606_v19, %v2772_v4  ;;  %vm937_vm14 = vweird.f32 %v2623_v44  ;;  %1472 = vmatpush.msrb.mxu3 %v1412_v23  ;;  %v1387_v23 = vld [vmem:[%s3230_s3 + $0x30] sm:$0xff] }
 0x2ea   : > { %1794 = vrcp.f32 %v2708_v56  ;;  %v2728_v17 = vpop.eup %1792  ;;  %v1133_v25 = vmul.f32 %v2710_v22, %v2631_v48  ;;  %v2744_v29 = vpop.xlane.xlu2 %1214  ;;  %v926_v52 = vsel %vm2732_vm7, %v2625_v31, %v922_v16  ;;  %v1644_v31 = vld [vmem:[%s3232_s5 + $0x10] sm:$0xff]  ;;  %v737_v15 = vadd.f32 %v735_v47, %v648_v49  ;;  %vm2879_vm9 = vmor %vm1026_vm10, %vm1027_vm13 }
 0x2eb   : > { %v2758_v62 = vpop.xlane.xlu1 %1130  ;;  %v933_v54 = vmul.f32 %v2728_v17, %v2623_v44  ;;  %1796 = vrcp.f32 %v2744_v29  ;;  %v931_v42 = vsel %vm928_vm8, %v930_v57, %v926_v52  ;;  %v857_v50 = vadd.f32 %v1644_v31, %v855_v33  ;;  %v1392_v44 = vld [vmem:[%s3230_s3 + $0x58] sm:$0xff] }
 0x2ec   : > { %v1134_v0 = vsub.f32 1.0, %v1133_v25  ;;  %1798 = vrcp.f32 %v2758_v62  ;;  %v946_v46 = vmul.f32 %v2442_v59, %v931_v42  ;;  %v1024_v59 = vmul.f32 %v2697_v51, %v1023_v41  ;;  %1643 = vmatmul.msk.f32.gmra.mxu1 %vm503_vm1, %v737_v15  ;;  %v1386_v15 = vld [vmem:[%s3230_s3 + $0x28] sm:$0xff] }
 0x2ed   : > { %v934_v26 = vsub.f32 1.0, %v933_v54  ;;  %v2810_v37 = vor.u32 1.1754944e-38, %v943_v7  ;;  %vm1137_vm15 = vweird.f32 %v2631_v48  ;;  %vm938_vm2 = vweird.f32 %v2728_v17  ;;  %v1396_v54 = vld [vmem:[%s3230_s3 + $0x78] sm:$0xff]  ;;  %v1394_v7 = vld [vmem:[%s3230_s3 + $0x68] sm:$0xff] }
 0x2ee   : > { %v1135_v45 = vmul.f32 %v2710_v22, %v1134_v0  ;;  %vm1138_vm3 = vweird.f32 %v2710_v22  ;;  %vm2816_vm5 = vcmp.eq.f32.partialorder %v1141_v2, 8.507059e+37  ;;  %v948_v55 = vadd.f32 %v946_v46, %v857_v50  ;;  %v1395_v0 = vld [vmem:[%s3230_s3 + $0x70] sm:$0xff]  ;;  %1449 = vmatpush.msrb.mxu2 %v1396_v54 }
 0x2ef   : > { %v935_v10 = vmul.f32 %v2728_v17, %v934_v26  ;;  %v2830_v52 = vadd.f32 %v2697_v51, %v1024_v59  ;;  %vm2832_vm0 = vcmp.eq.f32.partialorder %v941_v9, 8.507059e+37  ;;  %v1144_v33 = vor.u32 1.1754944e-38, %v1143_v12  ;;  %vm2857_vm8 = vmor %vm1137_vm15, %vm1138_vm3  ;;  %v1411_v12 = vld [vmem:[%s3230_s3 + $0xf0] sm:$0xff] }
 0x2f0   : > { %v2769_v63 = vpop.eup %1794  ;;  %v1136_v25 = vadd.f32 %v2710_v22, %v1135_v45  ;;  %vm2844_vm4 = vcmp.eq.f32.partialorder %v1030_v53, 8.507059e+37  ;;  %vm1315_vm6 = vweird.f32 %v2708_v56  ;;  %v1321_v42 = vand.u32 2147483648, %v2708_v56  ;;  %1450 = vmatpush.msrb.mxu2 %v1395_v0  ;;  %v1393_v45 = vld [vmem:[%s3230_s3 + $0x60] sm:$0xff]  ;;  %vm2917_vm3 = vmor %vm937_vm14, %vm938_vm2  ;;  %1473 = vmatpush.msrb.mxu3 %v1411_v12 }
 0x2f1   : > { %v2779_v20 = vpop.xlane.xlu0 %1308  ;;  %v1311_v16 = vmul.f32 %v2769_v63, %v2708_v56  ;;  %v2803_v32 = vpop.eup %1796  ;;  %v1228_v41 = vand.u32 2147483647, %v2744_v29  ;;  %v1230_v3 = vand.u32 2147483648, %v2744_v29  ;;  %v1037_v9 = vadd.f32 %v2713_v30, %v948_v55 }
 0x2f2   : > { %1800 = vrcp.f32 %v2779_v20  ;;  %v1220_v19 = vmul.f32 %v2803_v32, %v2744_v29  ;;  %v2823_v38 = vpop.eup %1798  ;;  %v2827_v39 = vpop.xlane.xlu2 %1217  ;;  %vm1225_vm7 = vweird.f32 %v2803_v32  ;;  %v936_v2 = vadd.f32 %v2728_v17, %v935_v10  ;;  %1451 = vmatpush.msrb.mxu2 %v1394_v7  ;;  %v1410_v10 = vld [vmem:[%s3230_s3 + $0xe8] sm:$0xff] }
 0x2f3   : > { %v1312_v34 = vsub.f32 1.0, %v1311_v16  ;;  %v1147_v31 = vmul.f32 %v2823_v38, %v2758_v62  ;;  %1802 = vrcp.f32 %v2827_v39  ;;  %v1140_v48 = vsel %vm2857_vm8, %v2710_v22, %v1136_v25  ;;  %1474 = vmatpush.msrb.mxu3 %v1410_v10 }
 0x2f4   : > { %v1221_v57 = vsub.f32 1.0, %v1220_v19  ;;  %v1319_v47 = vand.u32 2147483647, %v2708_v56  ;;  %vm1224_vm11 = vweird.f32 %v2744_v29  ;;  %vm1316_vm10 = vweird.f32 %v2769_v63  ;;  %1658 = vmatmul.msk.f32.vlgmr.msrb.gmra.mxu1 %vm503_vm1, %v1037_v9  ;;  %1452 = vmatpush.msrb.mxu2 %v1393_v45 }
 0x2f5   : > { %v1148_v4 = vsub.f32 1.0, %v1147_v31  ;;  %v1313_v49 = vmul.f32 %v2769_v63, %v1312_v34  ;;  %v2895_v16 = vor.u32 1.1754944e-38, %v1321_v42  ;;  %vm2899_vm13 = vmor %vm1224_vm11, %vm1225_vm7  ;;  %vm2903_vm15 = vcmp.eq.f32.partialorder %v1228_v41, 8.507059e+37  ;;  %v1401_v41 = vld [vmem:[%s3230_s3 + $0xa0] sm:$0xff] }
 0x2f6   : > { %v1222_v43 = vmul.f32 %v2803_v32, %v1221_v57  ;;  %v854_v59 = vsel %vm2796_vm12, %v2703_v14, %v849_v5  ;;  %v1145_v19 = vsel %vm2816_vm5, %v1144_v33, %v1140_v48  ;;  %v1231_v24 = vor.u32 1.1754944e-38, %v1230_v3  ;;  %1453 = vmatpush.msrb.mxu2 %v1392_v44  ;;  %vm2970_vm2 = vmor %vm1315_vm6, %vm1316_vm10  ;;  %v1384_v44 = vld [vmem:[%s3230_s3 + $0x18] sm:$0xff] }
 0x2f7   : > { %v1149_v26 = vmul.f32 %v2823_v38, %v1148_v4  ;;  %v856_v5 = vmul.f32 %v2438_v35, %v854_v59  ;;  %v1314_v6 = vadd.f32 %v2769_v63, %v1313_v49  ;;  %vm1151_vm12 = vweird.f32 %v2758_v62 }
 0x2f8   : > { %v2867_v50 = vpop.eup %1800  ;;  %v1223_v46 = vadd.f32 %v2803_v32, %v1222_v43  ;;  %v940_v35 = vsel %vm2917_vm3, %v2728_v17, %v936_v2  ;;  %v1029_v25 = vsel %vm2879_vm9, %v2697_v51, %v2830_v52  ;;  %vm1152_vm14 = vweird.f32 %v2823_v38  ;;  %v1391_v17 = vld [vmem:[%s3230_s3 + $0x50] sm:$0xff]  ;;  %v1409_v51 = vld [vmem:[%s3230_s3 + $0xe0] sm:$0xff] }
 0x2f9   : > { %v1325_v22 = vmul.f32 %v2867_v50, %v2779_v20  ;;  %v2946_v34 = vpop.eup %1802  ;;  %v1150_v33 = vadd.f32 %v2823_v38, %v1149_v26  ;;  %v1155_v52 = vand.u32 2147483647, %v2758_v62  ;;  %v1157_v31 = vand.u32 2147483648, %v2758_v62  ;;  %vm2992_vm5 = vmor %vm1151_vm12, %vm1152_vm14  ;;  %1454 = vmatpush.msrb.mxu2 %v1391_v17  ;;  %1475 = vmatpush.msrb.mxu3 %v1409_v51  ;;  %v1389_v62 = vld [vmem:[%s3230_s3 + $0x40] sm:$0xff]  ;;  %v1444_v17 = vld [vmem:[%s3230_s3 + $0x1f8] sm:$0xff] }
 0x2fa   : > { %v1227_v14 = vsel %vm2899_vm13, %v2803_v32, %v1223_v46  ;;  %v1645_v32 = vld [vmem:[%s3232_s5 + $0x18] sm:$0xff]  ;;  %v1234_v54 = vmul.f32 %v2946_v34, %v2827_v39  ;;  %v945_v0 = vsel %vm2832_vm0, %v2810_v37, %v940_v35  ;;  %v1160_v42 = vmul.f32 %v2457_v13, %v1145_v19  ;;  %v1390_v37 = vld [vmem:[%s3230_s3 + $0x48] sm:$0xff]  ;;  %v1660_v13 = vld [vmem:[%s3232_s5 + $0x20] sm:$0xff]  ;;  %1518 = vmatpush.msrb.mxu1 %v1444_v17 }
 0x2fb   : > { %v1232_v55 = vsel %vm2903_vm15, %v1231_v24, %v1227_v14  ;;  %v1326_v57 = vsub.f32 1.0, %v1325_v22  ;;  %v858_v3 = vadd.f32 %v1645_v32, %v856_v5  ;;  %v947_v53 = vmul.f32 %v2455_v8, %v945_v0  ;;  %1455 = vmatpush.msrb.mxu2 %v1390_v37  ;;  %v1661_v19 = vld [vmem:[%s3232_s5 + $0x28] sm:$0xff]  ;;  %v1405_v51 = vld [vmem:[%s3230_s3 + $0xc0] sm:$0xff]  ;;  %v1403_v0 = vld [vmem:[%s3230_s3 + $0xb0] sm:$0xff] }
 0x2fc   : > { %v1034_v40 = vsel %vm2844_vm4, %v2756_v60, %v1029_v25  ;;  %v1318_v43 = vsel %vm2970_vm2, %v2769_v63, %v1314_v6  ;;  %v1247_v4 = vmul.f32 %v2467_v21, %v1232_v55  ;;  %v1235_v60 = vsub.f32 1.0, %v1234_v54  ;;  %v1382_v32 = vld [vmem:[%s3230_s3 + $0x8] sm:$0xff]  ;;  %v1381_v25 = vld [vmem:[%s3230_s3] sm:$0xff]  ;;  %v1404_v54 = vld [vmem:[%s3230_s3 + $0xb8] sm:$0xff] }
 0x2fd   : > { %v1244_v1 = vand.u32 2147483648, %v2827_v39  ;;  %v1154_v9 = vsel %vm2992_vm5, %v2823_v38, %v1150_v33  ;;  %v1327_v63 = vmul.f32 %v2867_v50, %v1326_v57  ;;  %v949_v21 = vadd.f32 %v947_v53, %v858_v3  ;;  %1456 = vmatpush.msrb.mxu2 %v1389_v62  ;;  %v1406_v55 = vld [vmem:[%s3230_s3 + $0xc8] sm:$0xff]  ;;  %v1428_v33 = vld [vmem:[%s3230_s3 + $0x178] sm:$0xff]  ;;  %v1427_v57 = vld [vmem:[%s3230_s3 + $0x170] sm:$0xff] }
 0x2fe   : > { %v1036_v7 = vmul.f32 %v2444_v61, %v1034_v40  ;;  %v1158_v2 = vor.u32 1.1754944e-38, %v1157_v31  ;;  %v1236_v48 = vmul.f32 %v2946_v34, %v1235_v60  ;;  %vm1239_vm0 = vweird.f32 %v2946_v34  ;;  %v1388_v61 = vld [vmem:[%s3230_s3 + $0x38] sm:$0xff]  ;;  %1495 = vmatpush.msra.mxu0 %v1428_v33  ;;  %v1443_v31 = vld [vmem:[%s3230_s3 + $0x1f0] sm:$0xff]  ;;  %v1425_v3 = vld [vmem:[%s3230_s3 + $0x160] sm:$0xff] }
 0x2ff   : > { %v1242_v49 = vand.u32 2147483647, %v2827_v39  ;;  %v1162_v30 = vadd.f32 %v1660_v13, %v1160_v42  ;;  %vm1320_vm4 = vcmp.eq.f32.partialorder %v1319_v47, 8.507059e+37  ;;  %vm1156_vm6 = vcmp.eq.f32.partialorder %v1155_v52, 8.507059e+37  ;;  %1457 = vmatpush.msrb.mxu2 %v1388_v61  ;;  %v1426_v52 = vld [vmem:[%s3230_s3 + $0x168] sm:$0xff]  ;;  %1519 = vmatpush.msrb.mxu1 %v1443_v31  ;;  %v1400_v40 = vld [vmem:[%s3230_s3 + $0x98] sm:$0xff] }
 0x300   : > { %v1038_v38 = vadd.f32 %v1036_v7, %v949_v21  ;;  %v1323_v46 = vsel %vm1320_vm4, %v2895_v16, %v1318_v43  ;;  %v1159_v26 = vsel %vm1156_vm6, %v1158_v2, %v1154_v9  ;;  %v1237_v22 = vadd.f32 %v2946_v34, %v1236_v48  ;;  %1496 = vmatpush.msra.mxu0 %v1427_v57  ;;  %v1402_v42 = vld [vmem:[%s3230_s3 + $0xa8] sm:$0xff]  ;;  %v1424_v37 = vld [vmem:[%s3230_s3 + $0x158] sm:$0xff]  ;;  %v1441_v13 = vld [vmem:[%s3230_s3 + $0x1e0] sm:$0xff] }
 0x301   : > { %vm1238_vm7 = vweird.f32 %v2827_v39  ;;  %v1328_v45 = vadd.f32 %v2867_v50, %v1327_v63  ;;  %vm1330_vm8 = vweird.f32 %v2867_v50  ;;  %v1245_v56 = vor.u32 1.1754944e-38, %v1244_v1  ;;  %1458 = vmatpush.msrb.mxu2 %v1387_v23  ;;  %v1442_v53 = vld [vmem:[%s3230_s3 + $0x1e8] sm:$0xff]  ;;  %v1399_v43 = vld [vmem:[%s3230_s3 + $0x90] sm:$0xff]  ;;  %v1440_v8 = vld [vmem:[%s3230_s3 + $0x1d8] sm:$0xff] }
 0x302   : > { %vm1240_vm9 = vmor %vm1238_vm7, %vm1239_vm0  ;;  %1659 = vmatmul.msk.f32.gmra.mxu1 %vm503_vm1, %v1038_v38  ;;  %v1249_v47 = vadd.f32 %v1247_v4, %v1162_v30  ;;  %vm1329_vm11 = vweird.f32 %v2779_v20  ;;  %v1335_v39 = vand.u32 2147483648, %v2779_v20  ;;  %vm1243_vm10 = vcmp.eq.f32.partialorder %v1242_v49, 8.507059e+37  ;;  %1497 = vmatpush.msra.mxu0 %v1426_v52  ;;  %v1423_v4 = vld [vmem:[%s3230_s3 + $0x150] sm:$0xff]  ;;  %v1398_v60 = vld [vmem:[%s3230_s3 + $0x88] sm:$0xff] }
 0x303   : > { %v1241_v16 = vsel %vm1240_vm9, %v2946_v34, %v1237_v22  ;;  %v1338_v29 = vmul.f32 %v2465_v18, %v1323_v46  ;;  %v1161_v36 = vmul.f32 %v2471_v27, %v1159_v26  ;;  %v1333_v59 = vand.u32 2147483647, %v2779_v20  ;;  %vm1331_vm13 = vmor %vm1329_vm11, %vm1330_vm8  ;;  %v1385_v20 = vld [vmem:[%s3230_s3 + $0x20] sm:$0xff]  ;;  %1459 = vmatpush.msrb.mxu2 %v1386_v15  ;;  %v1408_v34 = vld [vmem:[%s3230_s3 + $0xd8] sm:$0xff]  ;;  %1520 = vmatpush.msrb.mxu1 %v1442_v53 }
 0x304   : > { %v1246_v12 = vsel %vm1243_vm10, %v1245_v56, %v1241_v16  ;;  %v1332_v14 = vsel %vm1331_vm13, %v2867_v50, %v1328_v45  ;;  %v1336_v24 = vor.u32 1.1754944e-38, %v1335_v39  ;;  %1476 = vmatpush.msrb.mxu3 %v1408_v34  ;;  %1498 = vmatpush.msra.mxu0 %v1425_v3  ;;  %v1422_v1 = vld [vmem:[%s3230_s3 + $0x148] sm:$0xff]  ;;  %v1439_v9 = vld [vmem:[%s3230_s3 + $0x1d0] sm:$0xff]  ;;  %v1397_v63 = vld [vmem:[%s3230_s3 + $0x80] sm:$0xff] }
 0x305   : > { %v1340_v18 = vadd.f32 %v1338_v29, %v1249_v47  ;;  %v1248_v27 = vmul.f32 %v2479_v28, %v1246_v12  ;;  %vm1334_vm15 = vcmp.eq.f32.partialorder %v1333_v59, 8.507059e+37  ;;  %v1163_v5 = vadd.f32 %v1661_v19, %v1161_v36  ;;  %1460 = vmatpush.msrb.mxu2 %v1385_v20  ;;  %v1383_v28 = vld [vmem:[%s3230_s3 + $0x10] sm:$0xff]  ;;  %1521 = vmatpush.msrb.mxu1 %v1441_v13  ;;  %v1421_v21 = vld [vmem:[%s3230_s3 + $0x140] sm:$0xff]  ;;  %v1438_v7 = vld [vmem:[%s3230_s3 + $0x1c8] sm:$0xff] }
 0x306   : > { %v1337_v10 = vsel %vm1334_vm15, %v1336_v24, %v1332_v14  ;;  %1499 = vmatpush.msra.mxu0 %v1424_v37  ;;  %v1420_v62 = vld [vmem:[%s3230_s3 + $0x138] sm:$0xff]  ;;  %v1437_v2 = vld [vmem:[%s3230_s3 + $0x1c0] sm:$0xff]  ;;  %v1419_v48 = vld [vmem:[%s3230_s3 + $0x130] sm:$0xff] }
 0x307   : > { %v1250_v50 = vadd.f32 %v1248_v27, %v1163_v5  ;;  %1461 = vmatpush.msrb.mxu2 %v1384_v44  ;;  %v1339_v6 = vmul.f32 %v2477_v58, %v1337_v10  ;;  %v1407_v58 = vld [vmem:[%s3230_s3 + $0xd0] sm:$0xff]  ;;  %1522 = vmatpush.msrb.mxu1 %v1440_v8  ;;  %v1436_v49 = vld [vmem:[%s3230_s3 + $0x1b8] sm:$0xff]  ;;  %v1418_v30 = vld [vmem:[%s3230_s3 + $0x128] sm:$0xff] }
 0x308   : > { %1477 = vmatpush.msrb.mxu3 %v1407_v58  ;;  %1500 = vmatpush.msra.mxu0 %v1423_v4  ;;  %v1435_v61 = vld [vmem:[%s3230_s3 + $0x1b0] sm:$0xff]  ;;  %v1417_v46 = vld [vmem:[%s3230_s3 + $0x120] sm:$0xff]  ;;  %v1434_v26 = vld [vmem:[%s3230_s3 + $0x1a8] sm:$0xff] }
 0x309   : > { %1462 = vmatpush.msrb.mxu2 %v1383_v28  ;;  %v1341_v35 = vadd.f32 %v1339_v6, %v1250_v50  ;;  %1523 = vmatpush.msrb.mxu1 %v1439_v9  ;;  %v1416_v22 = vld [vmem:[%s3230_s3 + $0x118] sm:$0xff]  ;;  %v1433_v45 = vld [vmem:[%s3230_s3 + $0x1a0] sm:$0xff]  ;;  %v1415_v56 = vld [vmem:[%s3230_s3 + $0x110] sm:$0xff] }
 0x30a   : > { %1674 = vmatmul.msk.f32.vlgmr.msra.gmra.mxu1 %vm503_vm1, %v1340_v18  ;;  %1478 = vmatpush.msrb.mxu3 %v1406_v55  ;;  %v1432_v47 = vld [vmem:[%s3230_s3 + $0x198] sm:$0xff]  ;;  %v1414_v23 = vld [vmem:[%s3230_s3 + $0x108] sm:$0xff]  ;;  %v1431_v39 = vld [vmem:[%s3230_s3 + $0x190] sm:$0xff] }
 0x30b   : > { %1463 = vmatpush.msrb.mxu2 %v1382_v32  ;;  %1501 = vmatpush.msra.mxu0 %v1422_v1  ;;  %v1413_v16 = vld [vmem:[%s3230_s3 + $0x100] sm:$0xff]  ;;  %v1430_v29 = vld [vmem:[%s3230_s3 + $0x188] sm:$0xff] }
 0x30c   : > { %1479 = vmatpush.msrb.mxu3 %v1405_v51  ;;  %1524 = vmatpush.msrb.mxu1 %v1438_v7  ;;  %v1429_v36 = vld [vmem:[%s3230_s3 + $0x180] sm:$0xff]  ;;  %v1805_v12 = vld [vmem:[%s2142_s11 + $0x8] sm:$0xff]  ;;  %s1627_s11 = sshll.u32 %s242_s19, 4 }
 0x30d   : > { %1464 = vmatpush.msrb.mxu2 %v1381_v25  ;;  %1502 = vmatpush.msra.mxu0 %v1421_v21  ;;  %v1731_v27 = vld [vmem:[%s3231_s4] ss:$0 sm:$0xff]  ;;  %s244_s26 = scalar_lea.vmem [#allocation3], %s1627_s11 }
 0x30e   : > { %1480 = vmatpush.msrb.mxu3 %v1404_v54  ;;  %1525 = vmatpush.msrb.mxu1 %v1437_v2  ;;  %s1558_s13 = sshll.u32 %s244_s26, 4  ;;  %s1559_s13 = int_to_ptr.vmem [resolvable:$true] %s1558_s13 }
 0x30f   : > { %1503 = vmatpush.msra.mxu0 %v1420_v62 }
 0x310   : > { %1481 = vmatpush.msrb.mxu3 %v1403_v0  ;;  %1526 = vmatpush.msrb.mxu1 %v1436_v49 }
 0x311   : > { %1504 = vmatpush.msra.mxu0 %v1419_v48 }
 0x312   : > { %1675 = vmatmul.msk.f32.gmra.mxu1 %vm503_vm1, %v1341_v35  ;;  %1482 = vmatpush.msrb.mxu3 %v1402_v42 }
 0x313   : > { %1505 = vmatpush.msra.mxu0 %v1418_v30  ;;  %1527 = vmatpush.msrb.mxu1 %v1435_v61 }
 0x314   : > { %1483 = vmatpush.msrb.mxu3 %v1401_v41 }
 0x315   : > { %1506 = vmatpush.msra.mxu0 %v1417_v46  ;;  %1528 = vmatpush.msrb.mxu1 %v1434_v26 }
 0x316   : > { %1484 = vmatpush.msrb.mxu3 %v1400_v40 }
 0x317   : > { %1507 = vmatpush.msra.mxu0 %v1416_v22  ;;  %1529 = vmatpush.msrb.mxu1 %v1433_v45 }
 0x318   : > { %1485 = vmatpush.msrb.mxu3 %v1399_v43 }
 0x319   : > { %1508 = vmatpush.msra.mxu0 %v1415_v56  ;;  %1530 = vmatpush.msrb.mxu1 %v1432_v47 }
 0x31a   : > { %1486 = vmatpush.msrb.mxu3 %v1398_v60 }
 0x31b   : > { %1509 = vmatpush.msra.mxu0 %v1414_v23  ;;  %1531 = vmatpush.msrb.mxu1 %v1431_v39 }
 0x31c   : > { %1487 = vmatpush.msrb.mxu3 %v1397_v63 }
 0x31d   : > { %1510 = vmatpush.msra.mxu0 %v1413_v16  ;;  %1532 = vmatpush.msrb.mxu1 %v1430_v29 }
 0x31f   : > { %1533 = vmatpush.msrb.mxu1 %v1429_v36 }
 0x320   : > { %1534 = vmatmul.f32.vlgmr.msrb.gmra.mxu1 %v2674_v11 }
 0x328   : > { %1537 = vmatmul.f32.gmra.mxu1 %v1805_v12 }
 0x358   : > { %v761_v38 = vpop.f32.mrf.mxu1 }
 0x359   : > { %1465 = vmatmul.f32.vlgmr.msrb.gmra.mxu2 %v761_v38 }
 0x369   : > { %v764_v59 = vpop.f32.mrf.mxu1 }
 0x36a   : > { %1468 = vmatmul.f32.gmra.mxu2 %v764_v59 }
 0x371   : > { %v1062_v15 = vpop.f32.mrf.mxu1 }
 0x372   : > { %1488 = vmatmul.f32.vlgmr.msrb.gmra.mxu3 %v1062_v15 }
 0x37f   : > { %v1065_v19 = vpop.f32.mrf.mxu1 }
 0x380   : > { %1491 = vmatmul.f32.gmra.mxu3 %v1065_v19 }
 0x387   : > { %v1365_v14 = vpop.f32.mrf.mxu1 }
 0x388   : > { %1511 = vmatmul.f32.vlgmr.msra.gmra.mxu0 %v1365_v14 }
 0x38f   : > { %v1368_v18 = vpop.f32.mrf.mxu1 }
 0x390   : > { %1514 = vmatmul.f32.gmra.mxu0 %v1368_v18 }
 0x39d   : > { %v1535_v5 = vpop.f32.mrf.mxu1 }
 0x3a5   : > { %v1538_v55 = vpop.f32.mrf.mxu1 }
 0x3dc   : > { %v1466_v20 = vpop.f32.mrf.mxu2 }
 0x3dd   : > { %v1467_v24 = vadd.f32 %v1731_v27, %v1466_v20 }
 0x3ed   : > { %v1469_v28 = vpop.f32.mrf.mxu2 }
 0x3ee   : > { %v1470_v35 = vadd.f32 %v1731_v27, %v1469_v28 }
 0x3f5   : > { %v1489_v11 = vpop.f32.mrf.mxu3 }
 0x3f6   : > { %v1490_v44 = vadd.f32 %v1489_v11, %v1467_v24 }
 0x403   : > { %v1492_v32 = vpop.f32.mrf.mxu3 }
 0x404   : > { %v1493_v34 = vadd.f32 %v1492_v32, %v1470_v35 }
 0x405   : > { %v1512_v10 = vpop.f32.mrf.mxu0 }
 0x406   : > { %v1513_v50 = vadd.f32 %v1512_v10, %v1490_v44 }
 0x408   : > { %v1536_v6 = vadd.f32 %v1535_v5, %v1513_v50 }
 0x40a   : > { %v1541_v25 = vmax.f32 %v1536_v6, 0.0 }
 0x40c   : > { %1543 = vst [vmem:[%s244_s26] sm:$0xff] %v1541_v25 }
 0x40d   : > { %v1515_v58 = vpop.f32.mrf.mxu0 }
 0x40e   : > { %v1516_v33 = vadd.f32 %v1515_v58, %v1493_v34 }
 0x410   : > { %v1539_v57 = vadd.f32 %v1538_v55, %v1516_v33 }
 0x412   : > { %v1542_v17 = vmax.f32 %v1539_v57, 0.0 }
 0x414   : > { %1544 = vst [vmem:[%s244_s26 + $0x8] sm:$0xff] %v1542_v17 }
 0x415   : > { %1833 = shalt.err (!%p1830_p3)
}
 0x416   : > { %s1873_s19 = smov 128   ;;  %s1874_s20 = smov 8  }
 0x417   : > { %1687 = dma.vmem_to_hbm [thread:$0]  (%p1948_p5), %s1559_s13, 256, %s1561_s14, %s1546_s25, %s1873_s19, %s1873_s19, %s1874_s20  }
 0x418 PF: > { %p1693_p4 = scmp.ge.s32.totalorder %s1868_s24, 2  ;;  %s1575_s26 = sand.u32 1, %s1856_s21  }
 0x419   : > { %s1576_s29 = scalar_lea.sflag [#allocation4], %s1575_s26 }
 0x41a   : > { %p1690_p7 = pnand %p1693_p4, %p1952_p6 }
 0x41c   : > { %p1691_p8 = pneg %p1690_p7 }
 0x41e   : > { %1851 = dma.done.wait (%p1691_p8), %s1576_s29, 256  }
 0x41f   : > { %1853 = vsyncadd (%p1691_p8), %s1576_s29, 4294967040  ;;  %p16_p9 = scmp.ge.s32.totalorder %s1935_s27, 4   ;;  %s3286_s21 = smov %s1860_s22 }
 0x420   : > { %s3287_s22 = smov %s1864_s23  ;;  %s3288_s23 = smov %s1946_s30 }
 0x421   : > { %s3289_s24 = smov %s1935_s27  ;;  %18 = sbr.rel (!%p16_p9) target bundleno = 3 (0x3), region = 81 }
 0x426   :  { %1582 = vsyncpa [#allocation4], 1 }
 0x427   :  { %1584 = vsyncpa [#allocation4 + $0x1], 1 }

</bundles_post_ra>
